<compile_context>
chip_gen: v7x
topology: tpu7x:2x2x1
jax: 0.10.0
libtpu: 0.0.40
codegen_flags: <defaults>
</compile_context>

<pallas_src>
import numpy as np

import jax
import jax.numpy as jnp
from jax.experimental import pallas as pl
from jax.experimental.pallas import tpu as pltpu


# ----------------------------------------------------------------------------
# Compile-time constant selection tensors (weight-independent conv structure)
# ----------------------------------------------------------------------------
def _build_s1():
    # S1[r*14+iw, corner, s, q, kh, kw] = 1  iff  r = 2s+di+kh, iw = 2q+dj+kw
    # (corner = di*2+dj).  Folds conv1 (3x3, 1->32) + output ordering
    # (corner, pooled-row-pair s, pooled-col q, channel) for 6 input rows.
    s1 = np.zeros((84, 4, 2, 6, 3, 3), np.float32)
    for e in range(4):
        di, dj = divmod(e, 2)
        for s in range(2):
            for q in range(6):
                for kh in range(3):
                    for kw in range(3):
                        r = 2 * s + di + kh          # [0, 6)
                        iw = 2 * q + dj + kw         # [0, 14)
                        s1[r * 14 + iw, e, s, q, kh, kw] = 1.0
    return s1


def _build_s2():
    # S2[r2, q, corner, q2, kh, kw] = 1  iff  r2 = di+kh, q = 2*q2+dj+kw.
    # Folds conv2 (3x3, 32->64) + output ordering (corner, q2, channel)
    # for a 4-pooled-row input window.
    s2 = np.zeros((4, 6, 4, 2, 3, 3), np.float32)
    for e in range(4):
        di, dj = divmod(e, 2)
        for q2 in range(2):
            for kh in range(3):
                for kw in range(3):
                    r2 = di + kh                     # [0, 4)
                    q = 2 * q2 + dj + kw             # [0, 6)
                    s2[r2, q, e, q2, kh, kw] = 1.0
    return s2


_S1 = _build_s1()
_S2 = _build_s2()
# fc1 expects PyTorch CHW flatten (c*4 + p2*2 + q2); the kernel produces
# (p2, q2, c) blocks, so permute fc1's (transposed) weight rows accordingly.
_IDX_FC1 = [np.array([c * 4 + p2 * 2 + q for q in range(2) for c in range(64)],
                     np.int32) for p2 in range(2)]


# ----------------------------------------------------------------------------
# Fused per-branch / per-batch-block kernel (grid = (branch, batch_block))
# ----------------------------------------------------------------------------
def _convnet_al_kernel(xp_ref,                       # (3*Bb, 84)   bf16
                       r1_ref, b1_ref,               # (84,1536) bf16, (1,384) f32
                       r2_ref, b2_ref,               # (768,512) bf16, (1,128) f32
                       w1_ref, bf1_ref,              # (256,200) bf16, (1,200) f32
                       w2_ref, bf2_ref,              # (200,128) bf16, (1,128) f32
                       out_ref,                      # (Bb, 128) f32  [logits in 0:10]
                       h1g_ref, l2_ref, fcin_ref):   # scratch (3Bb,384),(2Bb,768),(Bb,256)
    f32, bf16 = jnp.float32, jnp.bfloat16
    B = out_ref.shape[0]

    # conv1 (folded) + 2x2 maxpool + ReLU — ONE GEMM covering all 3 pooled-row
    # pairs x batch rows (same r1 RHS streamed through the MXU once).
    o1 = jnp.dot(xp_ref[...], r1_ref[...], preferred_element_type=f32)   # (3B,1536)
    m1 = jnp.maximum(jnp.maximum(o1[:, 0:384], o1[:, 384:768]),
                     jnp.maximum(o1[:, 768:1152], o1[:, 1152:1536]))
    h1g_ref[...] = jnp.maximum(m1 + b1_ref[...], 0.0)                    # (3B,384)

    # Stack the two overlapping conv2 input windows into one (2B,768) LHS.
    l2_ref[0:B, 0:384] = h1g_ref[0:B, :]
    l2_ref[0:B, 384:768] = h1g_ref[B:2 * B, :]
    l2_ref[B:2 * B, 0:384] = h1g_ref[B:2 * B, :]
    l2_ref[B:2 * B, 384:768] = h1g_ref[2 * B:3 * B, :]

    # conv2 (folded) + 2x2 maxpool + ReLU — ONE GEMM for both pooled output rows.
    o2 = jnp.dot(l2_ref[...].astype(bf16), r2_ref[...],
                 preferred_element_type=f32)                             # (2B,512)
    m2 = jnp.maximum(jnp.maximum(o2[:, 0:128], o2[:, 128:256]),
                     jnp.maximum(o2[:, 256:384], o2[:, 384:512]))
    h2 = jnp.maximum(m2 + b2_ref[...], 0.0)                              # (2B,128)

    # Lane-concat the two 128-wide h2 slabs -> single (B,256) fc1 LHS.
    fcin_ref[:, 0:128] = h2[0:B]
    fcin_ref[:, 128:256] = h2[B:2 * B]

    # fc1 + ReLU — single (B,256)x(256,200) GEMM (w1a|w1b pre-concatenated).
    h3 = jnp.maximum(jnp.dot(fcin_ref[...].astype(bf16), w1_ref[...],
                             preferred_element_type=f32) + bf1_ref[...], 0.0)
    # fc2 (pre-ReLU auxiliary logits), zero-padded to 128 lanes -> unmasked store.
    out_ref[...] = (jnp.dot(h3.astype(bf16), w2_ref[...],
                            preferred_element_type=f32) + bf2_ref[...])


# ----------------------------------------------------------------------------
# One-time parameter folding (init/prep time, not per forward)
# ----------------------------------------------------------------------------
def prepare_params(params, weight_dtype=jnp.bfloat16):
    def fold_branch(sfx):
        wc1 = params[f"conv1_{sfx}_w"]              # (32, 1, 3, 3)
        bc1 = params[f"conv1_{sfx}_b"]              # (32,)
        wc2 = params[f"conv2_{sfx}_w"]              # (64, 32, 3, 3)
        bc2 = params[f"conv2_{sfx}_b"]              # (64,)
        r1 = jnp.einsum("xesqhw,chw->xesqc", _S1, wc1[:, 0]).reshape(84, 1536)
        r2 = jnp.einsum("rqeshw,cihw->rqiesc", _S2, wc2).reshape(768, 512)
        b1p = jnp.tile(bc1, 12).reshape(1, 384)
        b2p = jnp.tile(bc2, 2).reshape(1, 128)
        wf1t = params[f"fc1_{sfx}_w"].T             # (256, 200)
        w1 = jnp.concatenate([wf1t[_IDX_FC1[0]], wf1t[_IDX_FC1[1]]], axis=0)
        bf1 = params[f"fc1_{sfx}_b"].reshape(1, 200)
        w2p = jnp.zeros((200, 128), jnp.float32).at[:, 0:10].set(
            params[f"fc2_{sfx}_w"].T)               # lane-padded fc2 weight
        bf2p = jnp.zeros((1, 128), jnp.float32).at[:, 0:10].set(
            params[f"fc2_{sfx}_b"])
        return (r1.astype(weight_dtype), b1p,
                r2.astype(weight_dtype), b2p,
                w1.astype(weight_dtype), bf1,
                w2p.astype(weight_dtype), bf2p)

    bA = fold_branch(1)
    bB = fold_branch(2)
    stacked = tuple(jnp.stack([a, b], axis=0) for a, b in zip(bA, bB))

    # Tiny fc3/fc4 head stays f32 and runs in the wrapper.
    head = (params["fc3_w"].T,                      # (20, nb)
            params["fc3_b"].reshape(1, -1),         # (1, nb)
            params["fc4_w"].T,                      # (nb, 2)
            params["fc4_b"].reshape(1, 2))          # (1, 2)
    return stacked + head


# ----------------------------------------------------------------------------
# Forward wrapper
# ----------------------------------------------------------------------------
def convnet_al_forward(x, prepped):
    """x: (B, 2, 14, 14) f32 -> (w (B,2), y (B,10), z (B,10))."""
    B = x.shape[0]
    (r1s, b1s, r2s, b2s, w1s, bf1s, w2s, bf2s, w3t, bf3, w4t, bf4) = prepped

    # Batch tiling: weights use a constant batch index_map so they stay
    # VMEM-resident across batch blocks; branch axis is the outer grid axis.
    B_blk = min(B, 128)
    nbj = -(-B // B_blk)
    Bp = nbj * B_blk

    xs = x.reshape(B, 2, 196)
    if Bp != B:
        xs = jnp.concatenate([xs, jnp.zeros((Bp - B, 2, 196), xs.dtype)], axis=0)

    # Per branch k and pooled-row-pair pp: the 6-image-row (84-col) input slab.
    xw = jnp.stack(
        [jnp.stack([xs[:, k, 56 * pp:56 * pp + 84] for pp in range(3)], axis=0)
         for k in range(2)], axis=0)                 # (2, 3, Bp, 84)
    xprep = (xw.reshape(2, 3, nbj, B_blk, 84)
               .transpose(0, 2, 1, 3, 4)
               .reshape(2, nbj, 3 * B_blk, 84)
               .astype(jnp.bfloat16))                # (2, nbj, 3*B_blk, 84)

    wmap = lambda k, j: (k, 0, 0)                    # branch-indexed, batch-constant
    per_row_flops = 2 * (3 * 84 * 1536 + 2 * 768 * 512 + 256 * 200 + 200 * 128)
    flops = 2 * Bp * per_row_flops
    bytes_accessed = (int(xprep.size) * 2
                      + sum(int(a.size) * jnp.dtype(a.dtype).itemsize
                            for a in prepped[:8])
                      + 2 * Bp * 128 * 4)

    out = pl.pallas_call(
        _convnet_al_kernel,
        grid=(2, nbj),
        out_shape=jax.ShapeDtypeStruct((2, nbj, B_blk, 128), jnp.float32),
        in_specs=[
            pl.BlockSpec((None, None, 3 * B_blk, 84), lambda k, j: (k, j, 0, 0)),
            pl.BlockSpec((None, 84, 1536), wmap),
            pl.BlockSpec((None, 1, 384), wmap),
            pl.BlockSpec((None, 768, 512), wmap),
            pl.BlockSpec((None, 1, 128), wmap),
            pl.BlockSpec((None, 256, 200), wmap),
            pl.BlockSpec((None, 1, 200), wmap),
            pl.BlockSpec((None, 200, 128), wmap),
            pl.BlockSpec((None, 1, 128), wmap),
        ],
        out_specs=pl.BlockSpec((None, None, B_blk, 128), lambda k, j: (k, j, 0, 0)),
        scratch_shapes=[pltpu.VMEM((3 * B_blk, 384), jnp.float32),
                        pltpu.VMEM((2 * B_blk, 768), jnp.float32),
                        pltpu.VMEM((B_blk, 256), jnp.float32)],
        compiler_params=pltpu.CompilerParams(
            dimension_semantics=("parallel", "parallel")),
        cost_estimate=pl.CostEstimate(flops=int(flops),
                                      transcendentals=0,
                                      bytes_accessed=int(bytes_accessed)),
    )(xprep, r1s, b1s, r2s, b2s, w1s, bf1s, w2s, bf2s)

    logits = out.reshape(2, Bp, 128)[:, :B, :]
    y = logits[0, :, 0:10]                           # branch-1 aux logits
    z = logits[1, :, 0:10]                           # branch-2 aux logits

    # Tiny fc3/fc4 head (f32) on (B,20) data; kept in the wrapper so the
    # branch grid axis can be "parallel" (v7x: one TensorCore per branch).
    u = jnp.maximum(y, 0.0)
    v = jnp.maximum(z, 0.0)
    h4 = jnp.maximum(jnp.concatenate([u, v], axis=1) @ w3t + bf3, 0.0)
    w = h4 @ w4t + bf4
    return w, y, z


# ----------------------------------------------------------------------------
# Plain-JAX reference (follows the PyTorch code literally) for validation
# ----------------------------------------------------------------------------
def reference_forward(x, params):
    B = x.shape[0]

    def conv_pool_relu(img, w, b):                  # img (B, Cin, H, W)
        cout, cin = w.shape[0], w.shape[1]
        ho, wo = img.shape[2] - 2, img.shape[3] - 2
        cols = jnp.stack([img[:, :, kh:kh + ho, kw:kw + wo]
                          for kh in range(3) for kw in range(3)], axis=2)
        out = jnp.einsum("bcthw,dct->bdhw", cols, w.reshape(cout, cin, 9))
        out = out + b[None, :, None, None]
        out = jnp.maximum(jnp.maximum(out[:, :, 0::2, 0::2], out[:, :, 0::2, 1::2]),
                          jnp.maximum(out[:, :, 1::2, 0::2], out[:, :, 1::2, 1::2]))
        return jnp.maximum(out, 0.0)

    def branch(img, sfx):
        h = conv_pool_relu(img, params[f"conv1_{sfx}_w"], params[f"conv1_{sfx}_b"])
        h = conv_pool_relu(h, params[f"conv2_{sfx}_w"], params[f"conv2_{sfx}_b"])
        h = h.reshape(B, 256)
        h = jnp.maximum(h @ params[f"fc1_{sfx}_w"].T + params[f"fc1_{sfx}_b"], 0.0)
        return h @ params[f"fc2_{sfx}_w"].T + params[f"fc2_{sfx}_b"]

    y = branch(x[:, 0:1], 1)
    z = branch(x[:, 1:2], 2)
    w_in = jnp.concatenate([jnp.maximum(y, 0.0), jnp.maximum(z, 0.0)], axis=1)
    h4 = jnp.maximum(w_in @ params["fc3_w"].T + params["fc3_b"], 0.0)
    w = h4 @ params["fc4_w"].T + params["fc4_b"]
    return w, y, z


# ----------------------------------------------------------------------------
# Deterministic parameter init (PyTorch-default-style uniform bounds)
# ----------------------------------------------------------------------------
def init_params(key, nb_hidden=10):
    ks = jax.random.split(key, 20)

    def u(k, shape, fan_in):
        bound = 1.0 / float(fan_in) ** 0.5
        return jax.random.uniform(k, shape, jnp.float32, -bound, bound)

    p, i = {}, 0
    for sfx in (1, 2):
        p[f"conv1_{sfx}_w"] = u(ks[i], (32, 1, 3, 3), 9); i += 1
        p[f"conv1_{sfx}_b"] = u(ks[i], (32,), 9); i += 1
        p[f"conv2_{sfx}_w"] = u(ks[i], (64, 32, 3, 3), 32 * 9); i += 1
        p[f"conv2_{sfx}_b"] = u(ks[i], (64,), 32 * 9); i += 1
        p[f"fc1_{sfx}_w"] = u(ks[i], (200, 256), 256); i += 1
        p[f"fc1_{sfx}_b"] = u(ks[i], (200,), 256); i += 1
        p[f"fc2_{sfx}_w"] = u(ks[i], (10, 200), 200); i += 1
        p[f"fc2_{sfx}_b"] = u(ks[i], (10,), 200); i += 1
    p["fc3_w"] = u(ks[16], (nb_hidden, 20), 20)
    p["fc3_b"] = u(ks[17], (nb_hidden,), 20)
    p["fc4_w"] = u(ks[18], (2, nb_hidden), nb_hidden)
    p["fc4_b"] = u(ks[19], (2,), nb_hidden)
    return p


if __name__ == "__main__":
    key = jax.random.PRNGKey(0)
    pkey, xkey = jax.random.split(key)
    params = init_params(pkey, nb_hidden=10)
    prepped = prepare_params(params)                 # one-time weight folding (bf16)

    x = jax.random.normal(xkey, (2, 2, 14, 14), jnp.float32)

    fwd = jax.jit(convnet_al_forward)
    w, y, z = jax.block_until_ready(fwd(x, prepped))

    assert w.shape == (2, 2) and y.shape == (2, 10) and z.shape == (2, 10)
    assert w.dtype == jnp.float32

    # Validate against a straightforward plain-JAX f32 implementation.
    # bf16 weights/activations (with f32 accumulation) shift numerics, so the
    # tolerance is widened from 2e-3 to 2e-2.
    wr, yr, zr = jax.jit(reference_forward)(x, params)
    assert bool(jnp.all(jnp.isfinite(w))) and bool(jnp.all(jnp.isfinite(y)))
    assert bool(jnp.allclose(y, yr, atol=2e-2, rtol=2e-2))
    assert bool(jnp.allclose(z, zr, atol=2e-2, rtol=2e-2))
    assert bool(jnp.allclose(w, wr, atol=2e-2, rtol=2e-2))

    print("KERNEL_OK")
</pallas_src>

<mosaic_0001>
module attributes {stable_mosaic.version = 11 : i64} {
  func.func @_convnet_al_kernel(%arg0: i32, %arg1: i32, %arg2: memref<1x1x6x84xbf16, #tpu.memory_space<vmem>>, %arg3: memref<1x84x1536xbf16, #tpu.memory_space<vmem>>, %arg4: memref<1x1x384xf32, #tpu.memory_space<vmem>>, %arg5: memref<1x768x512xbf16, #tpu.memory_space<vmem>>, %arg6: memref<1x1x128xf32, #tpu.memory_space<vmem>>, %arg7: memref<1x256x200xbf16, #tpu.memory_space<vmem>>, %arg8: memref<1x1x200xf32, #tpu.memory_space<vmem>>, %arg9: memref<1x200x128xbf16, #tpu.memory_space<vmem>>, %arg10: memref<1x1x128xf32, #tpu.memory_space<vmem>>, %arg11: memref<1x1x2x128xf32, #tpu.memory_space<vmem>>, %arg12: memref<6x384xf32, #tpu.memory_space<vmem>>, %arg13: memref<4x768xf32, #tpu.memory_space<vmem>>, %arg14: memref<2x256xf32, #tpu.memory_space<vmem>>) attributes {dimension_semantics = [#tpu.dimension_semantics<parallel>, #tpu.dimension_semantics<parallel>], iteration_bounds = array<i64: 2, 1>, scalar_prefetch = 0 : i64, scratch_operands = 3 : i64, tpu.core_type = #tpu.core_type<tc>, window_params = [{transform_indices = @transform_0, window_bounds = array<i64: 1, 1, 6, 84>}, {transform_indices = @transform_1, window_bounds = array<i64: 1, 84, 1536>}, {transform_indices = @transform_2, window_bounds = array<i64: 1, 1, 384>}, {transform_indices = @transform_3, window_bounds = array<i64: 1, 768, 512>}, {transform_indices = @transform_4, window_bounds = array<i64: 1, 1, 128>}, {transform_indices = @transform_5, window_bounds = array<i64: 1, 256, 200>}, {transform_indices = @transform_6, window_bounds = array<i64: 1, 1, 200>}, {transform_indices = @transform_7, window_bounds = array<i64: 1, 200, 128>}, {transform_indices = @transform_8, window_bounds = array<i64: 1, 1, 128>}, {transform_indices = @transform_9, window_bounds = array<i64: 1, 1, 2, 128>}]} {
    %c0 = arith.constant 0 : index
    %c0_0 = arith.constant 0 : index
    %c0_1 = arith.constant 0 : index
    %c0_2 = arith.constant 0 : index
    %0 = vector.load %arg2[%c0, %c0_0, %c0_1, %c0_2] : memref<1x1x6x84xbf16, #tpu.memory_space<vmem>>, vector<1x1x6x84xbf16>
    %1 = vector.shape_cast %0 : vector<1x1x6x84xbf16> to vector<6x84xbf16>
    %c0_3 = arith.constant 0 : index
    %c0_4 = arith.constant 0 : index
    %c0_5 = arith.constant 0 : index
    %2 = vector.load %arg3[%c0_3, %c0_4, %c0_5] : memref<1x84x1536xbf16, #tpu.memory_space<vmem>>, vector<1x84x1536xbf16>
    %3 = vector.shape_cast %2 : vector<1x84x1536xbf16> to vector<84x1536xbf16>
    %cst = arith.constant dense<0.000000e+00> : vector<6x1536xf32>
    %4 = tpu.matmul %1, %3, %cst {dimension_numbers = #tpu.dot_dimension_numbers<[1], [0], [0], [1], [0, 0, 1, 1], [], []>} : vector<6x84xbf16>, vector<84x1536xbf16>, vector<6x1536xf32> -> vector<6x1536xf32>
    %5 = vector.extract_strided_slice %4 {offsets = [0, 0], sizes = [6, 384], strides = [1, 1]} : vector<6x1536xf32> to vector<6x384xf32>
    %6 = vector.extract_strided_slice %4 {offsets = [0, 384], sizes = [6, 384], strides = [1, 1]} : vector<6x1536xf32> to vector<6x384xf32>
    %7 = arith.maximumf %5, %6 : vector<6x384xf32>
    %8 = vector.extract_strided_slice %4 {offsets = [0, 768], sizes = [6, 384], strides = [1, 1]} : vector<6x1536xf32> to vector<6x384xf32>
    %9 = vector.extract_strided_slice %4 {offsets = [0, 1152], sizes = [6, 384], strides = [1, 1]} : vector<6x1536xf32> to vector<6x384xf32>
    %10 = arith.maximumf %8, %9 : vector<6x384xf32>
    %11 = arith.maximumf %7, %10 : vector<6x384xf32>
    %c0_6 = arith.constant 0 : index
    %c0_7 = arith.constant 0 : index
    %c0_8 = arith.constant 0 : index
    %12 = vector.load %arg4[%c0_6, %c0_7, %c0_8] : memref<1x1x384xf32, #tpu.memory_space<vmem>>, vector<1x1x384xf32>
    %13 = vector.shape_cast %12 : vector<1x1x384xf32> to vector<1x384xf32>
    %14 = vector.broadcast %13 : vector<1x384xf32> to vector<6x384xf32>
    %15 = arith.addf %11, %14 : vector<6x384xf32>
    %cst_9 = arith.constant 0.000000e+00 : f32
    %16 = vector.broadcast %cst_9 : f32 to vector<6x384xf32>
    %17 = arith.maximumf %15, %16 : vector<6x384xf32>
    %c0_10 = arith.constant 0 : index
    %c0_11 = arith.constant 0 : index
    %18 = vector.load %arg12[%c0_10, %c0_11] : memref<6x384xf32, #tpu.memory_space<vmem>>, vector<6x384xf32>
    tpu.vector_store %arg12[%c0_10, %c0_11], %17 {strides = array<i32>} : memref<6x384xf32, #tpu.memory_space<vmem>>, vector<6x384xf32>,
    %c0_12 = arith.constant 0 : index
    %c0_13 = arith.constant 0 : index
    %19 = vector.load %arg12[%c0_12, %c0_13] : memref<6x384xf32, #tpu.memory_space<vmem>>, vector<2x384xf32>
    %c0_14 = arith.constant 0 : index
    %c0_15 = arith.constant 0 : index
    %20 = vector.load %arg13[%c0_14, %c0_15] : memref<4x768xf32, #tpu.memory_space<vmem>>, vector<2x384xf32>
    tpu.vector_store %arg13[%c0_14, %c0_15], %19 {strides = array<i32>} : memref<4x768xf32, #tpu.memory_space<vmem>>, vector<2x384xf32>,
    %c2 = arith.constant 2 : index
    %c0_16 = arith.constant 0 : index
    %21 = vector.load %arg12[%c2, %c0_16] : memref<6x384xf32, #tpu.memory_space<vmem>>, vector<2x384xf32>
    %c0_17 = arith.constant 0 : index
    %c384 = arith.constant 384 : index
    %22 = vector.load %arg13[%c0_17, %c384] : memref<4x768xf32, #tpu.memory_space<vmem>>, vector<2x384xf32>
    tpu.vector_store %arg13[%c0_17, %c384], %21 {strides = array<i32>} : memref<4x768xf32, #tpu.memory_space<vmem>>, vector<2x384xf32>,
    %c2_18 = arith.constant 2 : index
    %c0_19 = arith.constant 0 : index
    %23 = vector.load %arg12[%c2_18, %c0_19] : memref<6x384xf32, #tpu.memory_space<vmem>>, vector<2x384xf32>
    %c2_20 = arith.constant 2 : index
    %c0_21 = arith.constant 0 : index
    %24 = vector.load %arg13[%c2_20, %c0_21] : memref<4x768xf32, #tpu.memory_space<vmem>>, vector<2x384xf32>
    tpu.vector_store %arg13[%c2_20, %c0_21], %23 {strides = array<i32>} : memref<4x768xf32, #tpu.memory_space<vmem>>, vector<2x384xf32>,
    %c4 = arith.constant 4 : index
    %c0_22 = arith.constant 0 : index
    %25 = vector.load %arg12[%c4, %c0_22] : memref<6x384xf32, #tpu.memory_space<vmem>>, vector<2x384xf32>
    %c2_23 = arith.constant 2 : index
    %c384_24 = arith.constant 384 : index
    %26 = vector.load %arg13[%c2_23, %c384_24] : memref<4x768xf32, #tpu.memory_space<vmem>>, vector<2x384xf32>
    tpu.vector_store %arg13[%c2_23, %c384_24], %25 {strides = array<i32>} : memref<4x768xf32, #tpu.memory_space<vmem>>, vector<2x384xf32>,
    %c0_25 = arith.constant 0 : index
    %c0_26 = arith.constant 0 : index
    %27 = vector.load %arg13[%c0_25, %c0_26] : memref<4x768xf32, #tpu.memory_space<vmem>>, vector<4x768xf32>
    %28 = arith.truncf %27 : vector<4x768xf32> to vector<4x768xbf16>
    %c0_27 = arith.constant 0 : index
    %c0_28 = arith.constant 0 : index
    %c0_29 = arith.constant 0 : index
    %29 = vector.load %arg5[%c0_27, %c0_28, %c0_29] : memref<1x768x512xbf16, #tpu.memory_space<vmem>>, vector<1x768x512xbf16>
    %30 = vector.shape_cast %29 : vector<1x768x512xbf16> to vector<768x512xbf16>
    %cst_30 = arith.constant dense<0.000000e+00> : vector<4x512xf32>
    %31 = tpu.matmul %28, %30, %cst_30 {dimension_numbers = #tpu.dot_dimension_numbers<[1], [0], [0], [1], [0, 0, 1, 1], [], []>} : vector<4x768xbf16>, vector<768x512xbf16>, vector<4x512xf32> -> vector<4x512xf32>
    %32 = vector.extract_strided_slice %31 {offsets = [0, 0], sizes = [4, 128], strides = [1, 1]} : vector<4x512xf32> to vector<4x128xf32>
    %33 = vector.extract_strided_slice %31 {offsets = [0, 128], sizes = [4, 128], strides = [1, 1]} : vector<4x512xf32> to vector<4x128xf32>
    %34 = arith.maximumf %32, %33 : vector<4x128xf32>
    %35 = vector.extract_strided_slice %31 {offsets = [0, 256], sizes = [4, 128], strides = [1, 1]} : vector<4x512xf32> to vector<4x128xf32>
    %36 = vector.extract_strided_slice %31 {offsets = [0, 384], sizes = [4, 128], strides = [1, 1]} : vector<4x512xf32> to vector<4x128xf32>
    %37 = arith.maximumf %35, %36 : vector<4x128xf32>
    %38 = arith.maximumf %34, %37 : vector<4x128xf32>
    %c0_31 = arith.constant 0 : index
    %c0_32 = arith.constant 0 : index
    %c0_33 = arith.constant 0 : index
    %39 = vector.load %arg6[%c0_31, %c0_32, %c0_33] : memref<1x1x128xf32, #tpu.memory_space<vmem>>, vector<1x1x128xf32>
    %40 = vector.shape_cast %39 : vector<1x1x128xf32> to vector<1x128xf32>
    %41 = vector.broadcast %40 : vector<1x128xf32> to vector<4x128xf32>
    %42 = arith.addf %38, %41 : vector<4x128xf32>
    %cst_34 = arith.constant 0.000000e+00 : f32
    %43 = vector.broadcast %cst_34 : f32 to vector<4x128xf32>
    %44 = arith.maximumf %42, %43 : vector<4x128xf32>
    %45 = vector.extract_strided_slice %44 {offsets = [0, 0], sizes = [2, 128], strides = [1, 1]} : vector<4x128xf32> to vector<2x128xf32>
    %c0_35 = arith.constant 0 : index
    %c0_36 = arith.constant 0 : index
    %46 = vector.load %arg14[%c0_35, %c0_36] : memref<2x256xf32, #tpu.memory_space<vmem>>, vector<2x128xf32>
    tpu.vector_store %arg14[%c0_35, %c0_36], %45 {strides = array<i32>} : memref<2x256xf32, #tpu.memory_space<vmem>>, vector<2x128xf32>,
    %47 = vector.extract_strided_slice %44 {offsets = [2, 0], sizes = [2, 128], strides = [1, 1]} : vector<4x128xf32> to vector<2x128xf32>
    %c0_37 = arith.constant 0 : index
    %c128 = arith.constant 128 : index
    %48 = vector.load %arg14[%c0_37, %c128] : memref<2x256xf32, #tpu.memory_space<vmem>>, vector<2x128xf32>
    tpu.vector_store %arg14[%c0_37, %c128], %47 {strides = array<i32>} : memref<2x256xf32, #tpu.memory_space<vmem>>, vector<2x128xf32>,
    %c0_38 = arith.constant 0 : index
    %c0_39 = arith.constant 0 : index
    %49 = vector.load %arg14[%c0_38, %c0_39] : memref<2x256xf32, #tpu.memory_space<vmem>>, vector<2x256xf32>
    %50 = arith.truncf %49 : vector<2x256xf32> to vector<2x256xbf16>
    %c0_40 = arith.constant 0 : index
    %c0_41 = arith.constant 0 : index
    %c0_42 = arith.constant 0 : index
    %51 = vector.load %arg7[%c0_40, %c0_41, %c0_42] : memref<1x256x200xbf16, #tpu.memory_space<vmem>>, vector<1x256x200xbf16>
    %52 = vector.shape_cast %51 : vector<1x256x200xbf16> to vector<256x200xbf16>
    %cst_43 = arith.constant dense<0.000000e+00> : vector<2x200xf32>
    %53 = tpu.matmul %50, %52, %cst_43 {dimension_numbers = #tpu.dot_dimension_numbers<[1], [0], [0], [1], [0, 0, 1, 1], [], []>} : vector<2x256xbf16>, vector<256x200xbf16>, vector<2x200xf32> -> vector<2x200xf32>
    %c0_44 = arith.constant 0 : index
    %c0_45 = arith.constant 0 : index
    %c0_46 = arith.constant 0 : index
    %54 = vector.load %arg8[%c0_44, %c0_45, %c0_46] : memref<1x1x200xf32, #tpu.memory_space<vmem>>, vector<1x1x200xf32>
    %55 = vector.shape_cast %54 : vector<1x1x200xf32> to vector<1x200xf32>
    %56 = vector.broadcast %55 : vector<1x200xf32> to vector<2x200xf32>
    %57 = arith.addf %53, %56 : vector<2x200xf32>
    %cst_47 = arith.constant 0.000000e+00 : f32
    %58 = vector.broadcast %cst_47 : f32 to vector<2x200xf32>
    %59 = arith.maximumf %57, %58 : vector<2x200xf32>
    %60 = arith.truncf %59 : vector<2x200xf32> to vector<2x200xbf16>
    %c0_48 = arith.constant 0 : index
    %c0_49 = arith.constant 0 : index
    %c0_50 = arith.constant 0 : index
    %61 = vector.load %arg9[%c0_48, %c0_49, %c0_50] : memref<1x200x128xbf16, #tpu.memory_space<vmem>>, vector<1x200x128xbf16>
    %62 = vector.shape_cast %61 : vector<1x200x128xbf16> to vector<200x128xbf16>
    %cst_51 = arith.constant dense<0.000000e+00> : vector<2x128xf32>
    %63 = tpu.matmul %60, %62, %cst_51 {dimension_numbers = #tpu.dot_dimension_numbers<[1], [0], [0], [1], [0, 0, 1, 1], [], []>} : vector<2x200xbf16>, vector<200x128xbf16>, vector<2x128xf32> -> vector<2x128xf32>
    %c0_52 = arith.constant 0 : index
    %c0_53 = arith.constant 0 : index
    %c0_54 = arith.constant 0 : index
    %64 = vector.load %arg10[%c0_52, %c0_53, %c0_54] : memref<1x1x128xf32, #tpu.memory_space<vmem>>, vector<1x1x128xf32>
    %65 = vector.shape_cast %64 : vector<1x1x128xf32> to vector<1x128xf32>
    %66 = vector.broadcast %65 : vector<1x128xf32> to vector<2x128xf32>
    %67 = arith.addf %63, %66 : vector<2x128xf32>
    %c0_55 = arith.constant 0 : index
    %c0_56 = arith.constant 0 : index
    %c0_57 = arith.constant 0 : index
    %c0_58 = arith.constant 0 : index
    %68 = vector.load %arg11[%c0_55, %c0_56, %c0_57, %c0_58] : memref<1x1x2x128xf32, #tpu.memory_space<vmem>>, vector<1x1x2x128xf32>
    %69 = vector.shape_cast %68 : vector<1x1x2x128xf32> to vector<2x128xf32>
    %70 = vector.shape_cast %67 : vector<2x128xf32> to vector<1x1x2x128xf32>
    tpu.vector_store %arg11[%c0_55, %c0_56, %c0_57, %c0_58], %70 {strides = array<i32>} : memref<1x1x2x128xf32, #tpu.memory_space<vmem>>, vector<1x1x2x128xf32>,
    return
  }
  func.func @transform_0(%arg0: i32, %arg1: i32) -> (i32, i32, i32, i32) {
    %c0_i32 = arith.constant 0 : i32
    %c0_i32_0 = arith.constant 0 : i32
    %c0_i32_1 = arith.constant 0 : i32
    return %arg0, %arg1, %c0_i32, %c0_i32_0 : i32, i32, i32, i32
  }
  func.func @transform_1(%arg0: i32, %arg1: i32) -> (i32, i32, i32) {
    %c0_i32 = arith.constant 0 : i32
    %c0_i32_0 = arith.constant 0 : i32
    %c0_i32_1 = arith.constant 0 : i32
    return %arg0, %c0_i32, %c0_i32_0 : i32, i32, i32
  }
  func.func @transform_2(%arg0: i32, %arg1: i32) -> (i32, i32, i32) {
    %c0_i32 = arith.constant 0 : i32
    %c0_i32_0 = arith.constant 0 : i32
    %c0_i32_1 = arith.constant 0 : i32
    return %arg0, %c0_i32, %c0_i32_0 : i32, i32, i32
  }
  func.func @transform_3(%arg0: i32, %arg1: i32) -> (i32, i32, i32) {
    %c0_i32 = arith.constant 0 : i32
    %c0_i32_0 = arith.constant 0 : i32
    %c0_i32_1 = arith.constant 0 : i32
    return %arg0, %c0_i32, %c0_i32_0 : i32, i32, i32
  }
  func.func @transform_4(%arg0: i32, %arg1: i32) -> (i32, i32, i32) {
    %c0_i32 = arith.constant 0 : i32
    %c0_i32_0 = arith.constant 0 : i32
    %c0_i32_1 = arith.constant 0 : i32
    return %arg0, %c0_i32, %c0_i32_0 : i32, i32, i32
  }
  func.func @transform_5(%arg0: i32, %arg1: i32) -> (i32, i32, i32) {
    %c0_i32 = arith.constant 0 : i32
    %c0_i32_0 = arith.constant 0 : i32
    %c0_i32_1 = arith.constant 0 : i32
    return %arg0, %c0_i32, %c0_i32_0 : i32, i32, i32
  }
  func.func @transform_6(%arg0: i32, %arg1: i32) -> (i32, i32, i32) {
    %c0_i32 = arith.constant 0 : i32
    %c0_i32_0 = arith.constant 0 : i32
    %c0_i32_1 = arith.constant 0 : i32
    return %arg0, %c0_i32, %c0_i32_0 : i32, i32, i32
  }
  func.func @transform_7(%arg0: i32, %arg1: i32) -> (i32, i32, i32) {
    %c0_i32 = arith.constant 0 : i32
    %c0_i32_0 = arith.constant 0 : i32
    %c0_i32_1 = arith.constant 0 : i32
    return %arg0, %c0_i32, %c0_i32_0 : i32, i32, i32
  }
  func.func @transform_8(%arg0: i32, %arg1: i32) -> (i32, i32, i32) {
    %c0_i32 = arith.constant 0 : i32
    %c0_i32_0 = arith.constant 0 : i32
    %c0_i32_1 = arith.constant 0 : i32
    return %arg0, %c0_i32, %c0_i32_0 : i32, i32, i32
  }
  func.func @transform_9(%arg0: i32, %arg1: i32) -> (i32, i32, i32, i32) {
    %c0_i32 = arith.constant 0 : i32
    %c0_i32_0 = arith.constant 0 : i32
    %c0_i32_1 = arith.constant 0 : i32
    return %arg0, %arg1, %c0_i32, %c0_i32_0 : i32, i32, i32, i32
  }
}

</mosaic_0001>

<bundles_post_ra>
// kernel: convnet_al_forward.1
= control target key start
LH: loop header
LB: loop body
LE: loop exit
PB: predicated region body
PF: predicated region fallthrough
CT: control target
= control target key end

     0   :  { %s4211_s30 = smov 0   ;;  %s4213_s10 = smov 0   ;;  %s4661_s0 = inlined_call_operand.vmem [shape: bf16[2,1,6,84], index: 0, kind: input, shape index: {}]   ;;  %s4662_s1 = inlined_call_operand.vmem [shape: bf16[2,84,1536], index: 1, kind: input, shape index: {}]   ;;  %s4663_s2 = inlined_call_operand.vmem [shape: f32[2,1,384], index: 2, kind: input, shape index: {}]   ;;  %s4664_s3 = inlined_call_operand.vmem [shape: bf16[2,768,512], index: 3, kind: input, shape index: {}]   ;;  %s4665_s4 = inlined_call_operand.vmem [shape: f32[2,1,128], index: 4, kind: input, shape index: {}]   ;;  %s4666_s5 = inlined_call_operand.vmem [shape: bf16[2,256,200], index: 5, kind: input, shape index: {}]   ;;  %s4667_s6 = inlined_call_operand.vmem [shape: f32[2,1,200], index: 6, kind: input, shape index: {}]   ;;  %s4668_s7 = inlined_call_operand.vmem [shape: bf16[2,200,128], index: 7, kind: input, shape index: {}]   ;;  %s4669_s8 = inlined_call_operand.vmem [shape: f32[2,1,128], index: 8, kind: input, shape index: {}]   ;;  %s4670_s9 = inlined_call_operand.vmem [shape: f32[2,1,2,128], index: 9, kind: output, shape index: {}]  }
   0x1   :  { %s4215_s11 = smov 0  }
   0x2 LB: > { %s31_s12 = sadd.s32 1, %s4153_s10  ;;  %p3295_p0 = scmp.ge.s32.totalorder %s4157_s11, 1  ;;  %s4157_s11 = sphi %s4215_s11, %s19_s11   ;;  %s4153_s10 = sphi %s4213_s10, %s4672_s10   ;;  %s4149_s30 = sphi %s4211_s30, %s4671_s30  }
   0x3   : > { %p33_p1 = scmp.ge.s32.totalorder %s31_s12, 2  ;;  %p379_p2 = scmp.lt.s32.totalorder %s4157_s11, 3 }
   0x5   : > { %s4674_s12 = smov (%p33_p1, %s31_s12), 0  ;;  %p380_p3 = pnand %p3295_p0, %p379_p2 }
   0x6   : > { %p453_p4 = scmp.lt.s32.totalorder (!%p380_p3), %s4149_s30, 1  ;;  %v4159_v0 = vmov (!%p380_p3), 0   ;;  %vm903_vm0 = vcmask (!%p380_p3), 1041408   ;;  %vm899_vm1 = vcmask (!%p380_p3), 687104   ;;  %vm3082_vm2 = vcmask (!%p380_p3), 1043456  }
   0x7   : > { %383 = sbr.rel (%p380_p3) target bundleno = 1139 (0x473), region = 56  ;;  %972 = vmatprep.mubr.bf16.mxu0 (!%p380_p3), %v4159_v0  ;;  %1013 = vmatprep.mubr.bf16.mxu1 (!%p380_p3), %v4159_v0  ;;  %vm3078_vm3 = vcmask (!%p380_p3), 588800  }
   0xe   : > { %s4676_s30 = smov (!%p453_p4, %s4149_s30), 1 }
   0xf   : > { %s3650_s13 = smul.u32 528, %s4676_s30  ;;  %s3296_s17 = sshll.u32 %s4676_s30, 2 }
  0x10   : > { %s459_s20 = scalar_lea.vmem %s4661_s0, %s3296_s17  ;;  %s3652_s21 = smul.u32 1536, %s4676_s30 }
  0x11   : > { %s4237_s16 = scalar_lea.vmem %s4662_s1, %s3650_s13  ;;  %v4271_v31 = vld [vmem:[%s459_s20] sm:$0x7]  ;;  %s3651_s25 = smul.u32 3, %s4676_s30 }
  0x12   : > { %v3680_v1 = vld [vmem:[%s4237_s16 + $0x4] ss:$48 sps:$4 sm:$0xff]   ;;  %v3682_v2 = vld [vmem:[%s4237_s16 + $0xc] ss:$48 sps:$4 sm:$0xff]   ;;  %v3684_v3 = vld [vmem:[%s4237_s16] ss:$48 sps:$4 sm:$0xff]   ;;  %s4303_s24 = scalar_lea.vmem %s4664_s3, %s3652_s21  ;;  %s476_s22 = scalar_lea.vmem %s4665_s4, %s4676_s30 }
  0x13   : > { %940 = vmatprep.subr.bf16.mxu0 %v3680_v1  ;;  %v3685_v4 = vld [vmem:[%s4237_s16 + $0x8] ss:$48 sps:$4 sm:$0xff]   ;;  %981 = vmatprep.subr.bf16.mxu1 %v3682_v2  ;;  %v3686_v5 = vld [vmem:[%s4237_s16 + $0x64] ss:$48 sps:$4 sm:$0xff]   ;;  %v3688_v6 = vld [vmem:[%s4237_s16 + $0x6c] ss:$48 sps:$4 sm:$0xff]   ;;  %s468_s28 = scalar_lea.vmem %s4663_s2, %s3651_s25 }
  0x14   : > { %941 = vmatpush1.bf16.msra.mxu0 %v3684_v3  ;;  %982 = vmatpush1.bf16.msra.mxu1 %v3685_v4  ;;  %v3690_v7 = vld [vmem:[%s4237_s16 + $0x60] ss:$48 sps:$4 sm:$0xff]   ;;  %v3691_v8 = vld [vmem:[%s4237_s16 + $0x68] ss:$48 sps:$4 sm:$0xff]   ;;  %v3692_v9 = vld [vmem:[%s4237_s16 + $0xc4] ss:$48 sps:$4 sm:$0xff]  }
  0x15   : > { %942 = vmatprep.subr.bf16.mxu0 %v3686_v5  ;;  %983 = vmatprep.subr.bf16.mxu1 %v3688_v6  ;;  %v3694_v10 = vld [vmem:[%s4237_s16 + $0xcc] ss:$48 sps:$4 sm:$0xff]   ;;  %v3696_v11 = vld [vmem:[%s4237_s16 + $0xc0] ss:$48 sps:$4 sm:$0xff]   ;;  %v3697_v12 = vld [vmem:[%s4237_s16 + $0xc8] ss:$48 sps:$4 sm:$0xff]  }
  0x16   : > { %v3698_v13 = vld [vmem:[%s4237_s16 + $0x124] ss:$48 sps:$4 sm:$0xff]   ;;  %v3700_v14 = vld [vmem:[%s4237_s16 + $0x12c] ss:$48 sps:$4 sm:$0xff]   ;;  %v3702_v15 = vld [vmem:[%s4237_s16 + $0x120] ss:$48 sps:$4 sm:$0xff]  }
  0x17   : > { %v3703_v16 = vld [vmem:[%s4237_s16 + $0x128] ss:$48 sps:$4 sm:$0xff]   ;;  %v3704_v17 = vld [vmem:[%s4237_s16 + $0x184] ss:$48 sps:$4 sm:$0xff]   ;;  %v3706_v18 = vld [vmem:[%s4237_s16 + $0x18c] ss:$48 sps:$4 sm:$0xff]  }
  0x18   : > { %943 = vmatpush1.bf16.msra.mxu0 %v3690_v7  ;;  %984 = vmatpush1.bf16.msra.mxu1 %v3691_v8  ;;  %v563_v19 = vld [vmem:[%s4237_s16 + $0x1e0] sm:$0x33]  ;;  %v564_v20 = vld [vmem:[%s4237_s16 + $0x1e8] sm:$0x33]  ;;  %v565_v48 = vld [vmem:[%s4237_s16 + $0x1f0] sm:$0x33] }
  0x19   : > { %944 = vmatprep.subr.bf16.mxu0 %v3692_v9  ;;  %985 = vmatprep.subr.bf16.mxu1 %v3694_v10  ;;  %v3708_v21 = vld [vmem:[%s4237_s16 + $0x180] ss:$48 sps:$4 sm:$0xff]   ;;  %v3709_v22 = vld [vmem:[%s4237_s16 + $0x188] ss:$48 sps:$4 sm:$0xff]   ;;  %v3365_v23 = vcombine.high %v563_v19, %v563_v19  ;;  %v3367_v24 = vcombine.high %v564_v20, %v564_v20  ;;  %v3364_v25 = vcombine.low %v563_v19, %v563_v19  ;;  %v3716_v27 = vld [vmem:[%s4237_s16 + $0x14] ss:$48 sps:$4 sm:$0xff]  }
  0x1a   : > { %v3366_v26 = vcombine.low %v564_v20, %v564_v20  ;;  %v3719_v30 = vld [vmem:[%s4237_s16 + $0x1c] ss:$48 sps:$4 sm:$0xff]   ;;  %v3714_v32 = vld [vmem:[%s4237_s16 + $0x10] ss:$48 sps:$4 sm:$0xff]   ;;  %v3717_v33 = vld [vmem:[%s4237_s16 + $0x18] ss:$48 sps:$4 sm:$0xff]   ;;  %v3369_v52 = vcombine.high %v565_v48, %v565_v48  ;;  %v3368_v54 = vcombine.low %v565_v48, %v565_v48 }
  0x1b   : > { %v905_v28 = vsel %vm903_vm0, %v3364_v25, 0  ;;  %v3722_v34 = vld [vmem:[%s4237_s16 + $0x74] ss:$48 sps:$4 sm:$0xff]   ;;  %v3725_v35 = vld [vmem:[%s4237_s16 + $0x7c] ss:$48 sps:$4 sm:$0xff]   ;;  %s3633_s29 = sshll.u32 %s4676_s30, 8 }
  0x1c   : > { %945 = vmatpush1.bf16.msra.mxu0 %v3696_v11  ;;  %986 = vmatpush1.bf16.msra.mxu1 %v3697_v12  ;;  %v911_v29 = vsel %vm903_vm0, %v3366_v26, 0  ;;  %v3720_v36 = vld [vmem:[%s4237_s16 + $0x70] ss:$48 sps:$4 sm:$0xff]   ;;  %v3723_v37 = vld [vmem:[%s4237_s16 + $0x78] ss:$48 sps:$4 sm:$0xff]   ;;  %v917_v58 = vsel %vm903_vm0, %v3368_v54, 0  ;;  %s4440_s15 = scalar_lea.vmem %s4666_s5, %s3633_s29  ;;  %s493_s29 = scalar_lea.vmem %s4669_s8, %s4676_s30 }
  0x1d   : > { %946 = vmatprep.subr.bf16.mxu0 %v3698_v13  ;;  %987 = vmatprep.subr.bf16.mxu1 %v3700_v14  ;;  %v3728_v38 = vld [vmem:[%s4237_s16 + $0xd4] ss:$48 sps:$4 sm:$0xff]   ;;  %v3731_v39 = vld [vmem:[%s4237_s16 + $0xdc] ss:$48 sps:$4 sm:$0xff]   ;;  %v3726_v40 = vld [vmem:[%s4237_s16 + $0xd0] ss:$48 sps:$4 sm:$0xff]  }
  0x1e   : > { %v3729_v41 = vld [vmem:[%s4237_s16 + $0xd8] ss:$48 sps:$4 sm:$0xff]   ;;  %v3734_v42 = vld [vmem:[%s4237_s16 + $0x134] ss:$48 sps:$4 sm:$0xff]   ;;  %v3737_v43 = vld [vmem:[%s4237_s16 + $0x13c] ss:$48 sps:$4 sm:$0xff]  }
  0x1f   : > { %v3732_v44 = vld [vmem:[%s4237_s16 + $0x130] ss:$48 sps:$4 sm:$0xff]   ;;  %v3735_v45 = vld [vmem:[%s4237_s16 + $0x138] ss:$48 sps:$4 sm:$0xff]   ;;  %v3740_v46 = vld [vmem:[%s4237_s16 + $0x194] ss:$48 sps:$4 sm:$0xff]  }
  0x20   : > { %947 = vmatpush1.bf16.msra.mxu0 %v3702_v15  ;;  %988 = vmatpush1.bf16.msra.mxu1 %v3703_v16  ;;  %v3743_v47 = vld [vmem:[%s4237_s16 + $0x19c] ss:$48 sps:$4 sm:$0xff]   ;;  %v3738_v50 = vld [vmem:[%s4237_s16 + $0x190] ss:$48 sps:$4 sm:$0xff]   ;;  %v3741_v51 = vld [vmem:[%s4237_s16 + $0x198] ss:$48 sps:$4 sm:$0xff]  }
  0x21   : > { %948 = vmatprep.subr.bf16.mxu0 %v3704_v17  ;;  %989 = vmatprep.subr.bf16.mxu1 %v3706_v18  ;;  %v566_v49 = vld [vmem:[%s4237_s16 + $0x1f8] sm:$0x33]  ;;  %v3750_v56 = vld [vmem:[%s4237_s16 + $0x24] ss:$48 sps:$4 sm:$0xff]   ;;  %v3748_v60 = vld [vmem:[%s4237_s16 + $0x20] ss:$48 sps:$4 sm:$0xff]  }
  0x22   : > { %v3371_v53 = vcombine.high %v566_v49, %v566_v49  ;;  %v3370_v55 = vcombine.low %v566_v49, %v566_v49  ;;  %v3753_v57 = vld [vmem:[%s4237_s16 + $0x2c] ss:$48 sps:$4 sm:$0xff]   ;;  %v3751_v61 = vld [vmem:[%s4237_s16 + $0x28] ss:$48 sps:$4 sm:$0xff]   ;;  %v3756_v62 = vld [vmem:[%s4237_s16 + $0x84] ss:$48 sps:$4 sm:$0xff]  }
  0x23   : > { %v3759_v63 = vld [vmem:[%s4237_s16 + $0x8c] ss:$48 sps:$4 sm:$0xff]   ;;  %v3754_v1 = vld [vmem:[%s4237_s16 + $0x80] ss:$48 sps:$4 sm:$0xff]   ;;  %v3757_v2 = vld [vmem:[%s4237_s16 + $0x88] ss:$48 sps:$4 sm:$0xff]  }
  0x24   : > { %949 = vmatpush1.bf16.msra.mxu0 %v3708_v21  ;;  %990 = vmatpush1.bf16.msra.mxu1 %v3709_v22  ;;  %v923_v59 = vsel %vm903_vm0, %v3370_v55, 0  ;;  %v3762_v3 = vld [vmem:[%s4237_s16 + $0xe4] ss:$48 sps:$4 sm:$0xff]   ;;  %v3765_v4 = vld [vmem:[%s4237_s16 + $0xec] ss:$48 sps:$4 sm:$0xff]   ;;  %s3301_s23 = sshll.u32 %s4676_s30, 1 }
  0x25   : > { %3376 = vmatprep.subr.msk.bf16.mxu0 %vm903_vm0, %v3365_v23  ;;  %3378 = vmatprep.subr.msk.bf16.mxu1 %vm903_vm0, %v3367_v24  ;;  %v3760_v5 = vld [vmem:[%s4237_s16 + $0xe0] ss:$48 sps:$4 sm:$0xff]   ;;  %v3763_v6 = vld [vmem:[%s4237_s16 + $0xe8] ss:$48 sps:$4 sm:$0xff]   ;;  %v3768_v7 = vld [vmem:[%s4237_s16 + $0x144] ss:$48 sps:$4 sm:$0xff]   ;;  %s485_s26 = scalar_lea.vmem %s4667_s6, %s3301_s23 }
  0x26   : > { %v3771_v8 = vld [vmem:[%s4237_s16 + $0x14c] ss:$48 sps:$4 sm:$0xff]   ;;  %v3766_v9 = vld [vmem:[%s4237_s16 + $0x140] ss:$48 sps:$4 sm:$0xff]   ;;  %v3769_v10 = vld [vmem:[%s4237_s16 + $0x148] ss:$48 sps:$4 sm:$0xff]  }
  0x27   : > { %v3774_v11 = vld [vmem:[%s4237_s16 + $0x1a4] ss:$48 sps:$4 sm:$0xff]   ;;  %v3777_v12 = vld [vmem:[%s4237_s16 + $0x1ac] ss:$48 sps:$4 sm:$0xff]   ;;  %v3772_v15 = vld [vmem:[%s4237_s16 + $0x1a0] ss:$48 sps:$4 sm:$0xff]  }
  0x28   : > { %951 = vmatpush1.bf16.msra.mxu0 %v905_v28  ;;  %992 = vmatpush1.bf16.msra.mxu1 %v911_v29  ;;  %v567_v13 = vld [vmem:[%s4237_s16 + $0x200] sm:$0x33]  ;;  %v568_v14 = vld [vmem:[%s4237_s16 + $0x208] sm:$0x33] }
  0x29   : > { %1022 = vmatprep.subr.bf16.mxu0 %v3716_v27  ;;  %1063 = vmatprep.subr.bf16.mxu1 %v3719_v30  ;;  %v3775_v16 = vld [vmem:[%s4237_s16 + $0x1a8] ss:$48 sps:$4 sm:$0xff]   ;;  %v3373_v17 = vcombine.high %v567_v13, %v567_v13  ;;  %v3375_v18 = vcombine.high %v568_v14, %v568_v14  ;;  %v3372_v19 = vcombine.low %v567_v13, %v567_v13  ;;  %v3782_v23 = vld [vmem:[%s4303_s24] ss:$16 sps:$4 sm:$0xff]   ;;  %v3784_v24 = vld [vmem:[%s4303_s24 + $0x4] ss:$16 sps:$4 sm:$0xff]  }
  0x2a   : > { %v3374_v20 = vcombine.low %v568_v14, %v568_v14  ;;  %v3785_v25 = vld [vmem:[%s4303_s24 + $0x8] ss:$16 sps:$4 sm:$0xff]   ;;  %v3787_v26 = vld [vmem:[%s4303_s24 + $0xc] ss:$16 sps:$4 sm:$0xff]   ;;  %v3790_v27 = vld [vmem:[%s4303_s24 + $0x24] ss:$16 sps:$4 sm:$0xff]  }
  0x2b   : > { %3377 = vmatmul.mubr.msk.bf16.vlgmr.msra.gmra.mrb[0].mxu0 %vm899_vm1, %v4271_v31  ;;  %3379 = vmatmul.mubr.msk.bf16.vlgmr.msra.gmra.mrb[0].mxu1 %vm899_vm1, %v4271_v31  ;;  %v929_v21 = vsel %vm903_vm0, %v3372_v19, 0  ;;  %v3793_v28 = vld [vmem:[%s4303_s24 + $0x2c] ss:$16 sps:$4 sm:$0xff]   ;;  %v3788_v29 = vld [vmem:[%s4303_s24 + $0x20] ss:$16 sps:$4 sm:$0xff]   ;;  %s3653_s16 = smul.u32 100, %s4676_s30 }
  0x2c   : > { %1023 = vmatpush1.bf16.msra.mxu0 %v3714_v32  ;;  %1064 = vmatpush1.bf16.msra.mxu1 %v3717_v33  ;;  %v935_v22 = vsel %vm903_vm0, %v3374_v20, 0  ;;  %v3791_v30 = vld [vmem:[%s4303_s24 + $0x28] ss:$16 sps:$4 sm:$0xff]   ;;  %v3799_v32 = vld [vmem:[%s4303_s24 + $0x4c] ss:$16 sps:$4 sm:$0xff]  }
  0x2d   : > { %1024 = vmatprep.subr.bf16.mxu0 %v3722_v34  ;;  %1065 = vmatprep.subr.bf16.mxu1 %v3725_v35  ;;  %v3794_v33 = vld [vmem:[%s4303_s24 + $0x40] ss:$16 sps:$4 sm:$0xff]   ;;  %v3797_v34 = vld [vmem:[%s4303_s24 + $0x48] ss:$16 sps:$4 sm:$0xff]   ;;  %v3802_v35 = vld [vmem:[%s4303_s24 + $0x64] ss:$16 sps:$4 sm:$0xff]   ;;  %s4605_s19 = scalar_lea.vmem %s4668_s7, %s3653_s16 }
  0x2e   : > { %1054 = vmatprep.mubr.bf16.mxu0 %v4159_v0  ;;  %1095 = vmatprep.mubr.bf16.mxu1 %v4159_v0  ;;  %v3823_v48 = vld [vmem:[%s4303_s24 + $0xcc] ss:$16 sps:$4 sm:$0xff]   ;;  %v3818_v49 = vld [vmem:[%s4303_s24 + $0xc0] ss:$16 sps:$4 sm:$0xff]   ;;  %v3827_v54 = vld [vmem:[%s4303_s24 + $0xe8] ss:$16 sps:$4 sm:$0xff]  }
  0x2f   : > { %v3832_v55 = vld [vmem:[%s4303_s24 + $0x104] ss:$16 sps:$4 sm:$0xff]   ;;  %v3866_v13 = vld [vmem:[%s4303_s24 + $0x1ac] ss:$16 sps:$4 sm:$0xff]   ;;  %v3861_v14 = vld [vmem:[%s4303_s24 + $0x1a0] ss:$16 sps:$4 sm:$0xff]  }
  0x30   : > { %1025 = vmatpush1.bf16.msra.mxu0 %v3720_v36  ;;  %1066 = vmatpush1.bf16.msra.mxu1 %v3723_v37  ;;  %v3805_v36 = vld [vmem:[%s4303_s24 + $0x6c] ss:$16 sps:$4 sm:$0xff]   ;;  %v3800_v37 = vld [vmem:[%s4303_s24 + $0x60] ss:$16 sps:$4 sm:$0xff]   ;;  %v3870_v19 = vld [vmem:[%s4303_s24 + $0x1c8] ss:$16 sps:$4 sm:$0xff]  }
  0x31   : > { %1026 = vmatprep.subr.bf16.mxu0 %v3728_v38  ;;  %1067 = vmatprep.subr.bf16.mxu1 %v3731_v39  ;;  %v3803_v38 = vld [vmem:[%s4303_s24 + $0x68] ss:$16 sps:$4 sm:$0xff]   ;;  %v3808_v39 = vld [vmem:[%s4303_s24 + $0x84] ss:$16 sps:$4 sm:$0xff]  }
  0x32   : > { %v3875_v20 = vld [vmem:[%s4303_s24 + $0x1e4] ss:$16 sps:$4 sm:$0xff]  }
  0x34   : > { %1027 = vmatpush1.bf16.msra.mxu0 %v3726_v40  ;;  %1068 = vmatpush1.bf16.msra.mxu1 %v3729_v41  ;;  %v3811_v40 = vld [vmem:[%s4303_s24 + $0x8c] ss:$16 sps:$4 sm:$0xff]   ;;  %v3806_v41 = vld [vmem:[%s4303_s24 + $0x80] ss:$16 sps:$4 sm:$0xff]  }
  0x35   : > { %1028 = vmatprep.subr.bf16.mxu0 %v3734_v42  ;;  %1069 = vmatprep.subr.bf16.mxu1 %v3737_v43  ;;  %v3809_v42 = vld [vmem:[%s4303_s24 + $0x88] ss:$16 sps:$4 sm:$0xff]   ;;  %v3814_v43 = vld [vmem:[%s4303_s24 + $0xa4] ss:$16 sps:$4 sm:$0xff]  }
  0x38   : > { %1029 = vmatpush1.bf16.msra.mxu0 %v3732_v44  ;;  %1070 = vmatpush1.bf16.msra.mxu1 %v3735_v45  ;;  %v3817_v44 = vld [vmem:[%s4303_s24 + $0xac] ss:$16 sps:$4 sm:$0xff]   ;;  %v3812_v45 = vld [vmem:[%s4303_s24 + $0xa0] ss:$16 sps:$4 sm:$0xff]  }
  0x39   : > { %1030 = vmatprep.subr.bf16.mxu0 %v3740_v46  ;;  %1071 = vmatprep.subr.bf16.mxu1 %v3743_v47  ;;  %v3815_v46 = vld [vmem:[%s4303_s24 + $0xa8] ss:$16 sps:$4 sm:$0xff]   ;;  %v3820_v47 = vld [vmem:[%s4303_s24 + $0xc4] ss:$16 sps:$4 sm:$0xff]  }
  0x3c   : > { %1031 = vmatpush1.bf16.msra.mxu0 %v3738_v50  ;;  %1072 = vmatpush1.bf16.msra.mxu1 %v3741_v51  ;;  %v3821_v50 = vld [vmem:[%s4303_s24 + $0xc8] ss:$16 sps:$4 sm:$0xff]   ;;  %v3826_v51 = vld [vmem:[%s4303_s24 + $0xe4] ss:$16 sps:$4 sm:$0xff]  }
  0x3d   : > { %3380 = vmatprep.subr.msk.bf16.mxu0 %vm903_vm0, %v3369_v52  ;;  %3382 = vmatprep.subr.msk.bf16.mxu1 %vm903_vm0, %v3371_v53  ;;  %v3829_v52 = vld [vmem:[%s4303_s24 + $0xec] ss:$16 sps:$4 sm:$0xff]   ;;  %v3824_v53 = vld [vmem:[%s4303_s24 + $0xe0] ss:$16 sps:$4 sm:$0xff]  }
  0x40   : > { %1033 = vmatpush1.bf16.msra.mxu0 %v917_v58  ;;  %1074 = vmatpush1.bf16.msra.mxu1 %v923_v59  ;;  %v3833_v58 = vld [vmem:[%s4303_s24 + $0x108] ss:$16 sps:$4 sm:$0xff]   ;;  %v3839_v59 = vld [vmem:[%s4303_s24 + $0x124] ss:$16 sps:$4 sm:$0xff]  }
  0x41   : > { %1104 = vmatprep.subr.bf16.mxu0 %v3750_v56  ;;  %1145 = vmatprep.subr.bf16.mxu1 %v3753_v57  ;;  %v3835_v56 = vld [vmem:[%s4303_s24 + $0x10c] ss:$16 sps:$4 sm:$0xff]   ;;  %v3830_v57 = vld [vmem:[%s4303_s24 + $0x100] ss:$16 sps:$4 sm:$0xff]  }
  0x43   : > { %3381 = vmatmul.mubr.msk.bf16.vlgmr.msra.gmra.mrb[4].mxu0 %vm899_vm1, %v4271_v31  ;;  %3383 = vmatmul.mubr.msk.bf16.vlgmr.msra.gmra.mrb[4].mxu1 %vm899_vm1, %v4271_v31 }
  0x44   : > { %1105 = vmatpush1.bf16.msra.mxu0 %v3748_v60  ;;  %1146 = vmatpush1.bf16.msra.mxu1 %v3751_v61  ;;  %v3842_v60 = vld [vmem:[%s4303_s24 + $0x12c] ss:$16 sps:$4 sm:$0xff]   ;;  %v3837_v61 = vld [vmem:[%s4303_s24 + $0x120] ss:$16 sps:$4 sm:$0xff]  }
  0x45   : > { %1106 = vmatprep.subr.bf16.mxu0 %v3756_v62  ;;  %1147 = vmatprep.subr.bf16.mxu1 %v3759_v63  ;;  %v3840_v62 = vld [vmem:[%s4303_s24 + $0x128] ss:$16 sps:$4 sm:$0xff]   ;;  %v3845_v63 = vld [vmem:[%s4303_s24 + $0x144] ss:$16 sps:$4 sm:$0xff]  }
  0x46   : > { %1136 = vmatprep.mubr.bf16.mxu0 %v4159_v0  ;;  %1177 = vmatprep.mubr.bf16.mxu1 %v4159_v0 }
  0x48   : > { %1107 = vmatpush1.bf16.msra.mxu0 %v3754_v1  ;;  %1148 = vmatpush1.bf16.msra.mxu1 %v3757_v2  ;;  %v3848_v1 = vld [vmem:[%s4303_s24 + $0x14c] ss:$16 sps:$4 sm:$0xff]   ;;  %v3843_v2 = vld [vmem:[%s4303_s24 + $0x140] ss:$16 sps:$4 sm:$0xff]  }
  0x49   : > { %1108 = vmatprep.subr.bf16.mxu0 %v3762_v3  ;;  %1149 = vmatprep.subr.bf16.mxu1 %v3765_v4  ;;  %v3846_v3 = vld [vmem:[%s4303_s24 + $0x148] ss:$16 sps:$4 sm:$0xff]   ;;  %v3851_v4 = vld [vmem:[%s4303_s24 + $0x164] ss:$16 sps:$4 sm:$0xff]  }
  0x4c   : > { %1109 = vmatpush1.bf16.msra.mxu0 %v3760_v5  ;;  %1150 = vmatpush1.bf16.msra.mxu1 %v3763_v6  ;;  %v3854_v5 = vld [vmem:[%s4303_s24 + $0x16c] ss:$16 sps:$4 sm:$0xff]   ;;  %v3849_v6 = vld [vmem:[%s4303_s24 + $0x160] ss:$16 sps:$4 sm:$0xff]  }
  0x4d   : > { %1110 = vmatprep.subr.bf16.mxu0 %v3768_v7  ;;  %1151 = vmatprep.subr.bf16.mxu1 %v3771_v8  ;;  %v3852_v7 = vld [vmem:[%s4303_s24 + $0x168] ss:$16 sps:$4 sm:$0xff]   ;;  %v3857_v8 = vld [vmem:[%s4303_s24 + $0x184] ss:$16 sps:$4 sm:$0xff]  }
  0x50   : > { %1111 = vmatpush1.bf16.msra.mxu0 %v3766_v9  ;;  %1152 = vmatpush1.bf16.msra.mxu1 %v3769_v10  ;;  %v3860_v9 = vld [vmem:[%s4303_s24 + $0x18c] ss:$16 sps:$4 sm:$0xff]   ;;  %v3855_v10 = vld [vmem:[%s4303_s24 + $0x180] ss:$16 sps:$4 sm:$0xff]  }
  0x51   : > { %1112 = vmatprep.subr.bf16.mxu0 %v3774_v11  ;;  %1153 = vmatprep.subr.bf16.mxu1 %v3777_v12  ;;  %v3858_v11 = vld [vmem:[%s4303_s24 + $0x188] ss:$16 sps:$4 sm:$0xff]   ;;  %v3863_v12 = vld [vmem:[%s4303_s24 + $0x1a4] ss:$16 sps:$4 sm:$0xff]  }
  0x54   : > { %1113 = vmatpush1.bf16.msra.mxu0 %v3772_v15  ;;  %1154 = vmatpush1.bf16.msra.mxu1 %v3775_v16  ;;  %v3864_v15 = vld [vmem:[%s4303_s24 + $0x1a8] ss:$16 sps:$4 sm:$0xff]   ;;  %v3869_v16 = vld [vmem:[%s4303_s24 + $0x1c4] ss:$16 sps:$4 sm:$0xff]  }
  0x55   : > { %3384 = vmatprep.subr.msk.bf16.mxu0 %vm903_vm0, %v3373_v17  ;;  %3386 = vmatprep.subr.msk.bf16.mxu1 %vm903_vm0, %v3375_v18  ;;  %v3872_v17 = vld [vmem:[%s4303_s24 + $0x1cc] ss:$16 sps:$4 sm:$0xff]   ;;  %v3867_v18 = vld [vmem:[%s4303_s24 + $0x1c0] ss:$16 sps:$4 sm:$0xff]  }
  0x58   : > { %1115 = vmatpush1.bf16.msra.mxu0 %v929_v21  ;;  %1156 = vmatpush1.bf16.msra.mxu1 %v935_v22  ;;  %v3878_v21 = vld [vmem:[%s4303_s24 + $0x1ec] ss:$16 sps:$4 sm:$0xff]   ;;  %v3873_v22 = vld [vmem:[%s4303_s24 + $0x1e0] ss:$16 sps:$4 sm:$0xff]  }
  0x59   : > { %2438 = vmatprep.subr.bf16.mxu0 %v3784_v24  ;;  %2561 = vmatprep.subr.bf16.mxu1 %v3787_v26  ;;  %v3882_v24 = vld [vmem:[%s4303_s24 + $0x204] ss:$16 sps:$4 sm:$0xff]  }
  0x5b   : > { %3385 = vmatmul.mubr.msk.bf16.vlgmr.msra.gmra.mrb[8].mxu0 %vm899_vm1, %v4271_v31  ;;  %3387 = vmatmul.mubr.msk.bf16.vlgmr.msra.gmra.mrb[8].mxu1 %vm899_vm1, %v4271_v31  ;;  %v3796_v31 = vld [vmem:[%s4303_s24 + $0x44] ss:$16 sps:$4 sm:$0xff]  }
  0x5c   : > { %2439 = vmatpush1.bf16.msra.mxu0 %v3782_v23  ;;  %2562 = vmatpush1.bf16.msra.mxu1 %v3785_v25  ;;  %v3876_v23 = vld [vmem:[%s4303_s24 + $0x1e8] ss:$16 sps:$4 sm:$0xff]   ;;  %v3885_v25 = vld [vmem:[%s4303_s24 + $0x20c] ss:$16 sps:$4 sm:$0xff]  }
  0x5d   : > { %2440 = vmatprep.subr.bf16.mxu0 %v3790_v27  ;;  %2563 = vmatprep.subr.bf16.mxu1 %v3793_v28 }
  0x60   : > { %2441 = vmatpush1.bf16.msra.mxu0 %v3788_v29  ;;  %2564 = vmatpush1.bf16.msra.mxu1 %v3791_v30 }
  0x61   : > { %2442 = vmatprep.subr.bf16.mxu0 %v3796_v31  ;;  %2565 = vmatprep.subr.bf16.mxu1 %v3799_v32 }
  0x64   : > { %2443 = vmatpush1.bf16.msra.mxu0 %v3794_v33  ;;  %2566 = vmatpush1.bf16.msra.mxu1 %v3797_v34 }
  0x65   : > { %2444 = vmatprep.subr.bf16.mxu0 %v3802_v35  ;;  %2567 = vmatprep.subr.bf16.mxu1 %v3805_v36 }
  0x68   : > { %2445 = vmatpush1.bf16.msra.mxu0 %v3800_v37  ;;  %2568 = vmatpush1.bf16.msra.mxu1 %v3803_v38 }
  0x69   : > { %2446 = vmatprep.subr.bf16.mxu0 %v3808_v39  ;;  %2569 = vmatprep.subr.bf16.mxu1 %v3811_v40 }
  0x6c   : > { %2447 = vmatpush1.bf16.msra.mxu0 %v3806_v41  ;;  %2570 = vmatpush1.bf16.msra.mxu1 %v3809_v42 }
  0x6d   : > { %2448 = vmatprep.subr.bf16.mxu0 %v3814_v43  ;;  %2571 = vmatprep.subr.bf16.mxu1 %v3817_v44 }
  0x70   : > { %2449 = vmatpush1.bf16.msra.mxu0 %v3812_v45  ;;  %2572 = vmatpush1.bf16.msra.mxu1 %v3815_v46  ;;  %v1197_v45 = vlaneseq }
  0x71   : > { %2450 = vmatprep.subr.bf16.mxu0 %v3820_v47  ;;  %2573 = vmatprep.subr.bf16.mxu1 %v3823_v48  ;;  %v1195_v48 = vld [vmem:[%s468_s28] sm:$0x7] }
  0x72   : > { %v4412_v46 = vshrl.u32 %v1197_v45, 7  ;;  %v3898_v45 = vld [vmem:[%s4303_s24 + $0x24c] ss:$16 sps:$4 sm:$0xff]  }
  0x74   : > { %2451 = vmatpush1.bf16.msra.mxu0 %v3818_v49  ;;  %2574 = vmatpush1.bf16.msra.mxu1 %v3821_v50  ;;  %v1203_v47 = vsub.s32 1, %v4412_v46  ;;  %v1199_v49 = vsub.s32 0, %v4412_v46  ;;  %v1207_v50 = vsub.s32 2, %v4412_v46 }
  0x75   : > { %2452 = vmatprep.subr.bf16.mxu0 %v3826_v51  ;;  %2575 = vmatprep.subr.bf16.mxu1 %v3829_v52 }
  0x78   : > { %2453 = vmatpush1.bf16.msra.mxu0 %v3824_v53  ;;  %2576 = vmatpush1.bf16.msra.mxu1 %v3827_v54  ;;  %v1204_v54 = vrot.slane %v1195_v48, %v1203_v47 }
  0x79   : > { %2454 = vmatprep.subr.bf16.mxu0 %v3832_v55  ;;  %2577 = vmatprep.subr.bf16.mxu1 %v3835_v56 }
  0x7c   : > { %2455 = vmatpush1.bf16.msra.mxu0 %v3830_v57  ;;  %2578 = vmatpush1.bf16.msra.mxu1 %v3833_v58  ;;  %v1200_v58 = vrot.slane %v1195_v48, %v1199_v49 }
  0x7d   : > { %2456 = vmatprep.subr.bf16.mxu0 %v3839_v59  ;;  %2579 = vmatprep.subr.bf16.mxu1 %v3842_v60  ;;  %v1208_v60 = vrot.slane %v1195_v48, %v1207_v50  ;;  %v3893_v48 = vld [vmem:[%s4303_s24 + $0x240] ss:$16 sps:$4 sm:$0xff]   ;;  %v3896_v50 = vld [vmem:[%s4303_s24 + $0x248] ss:$16 sps:$4 sm:$0xff]  }
  0x80   : > { %2457 = vmatpush1.bf16.msra.mxu0 %v3837_v61  ;;  %2580 = vmatpush1.bf16.msra.mxu1 %v3840_v62 }
  0x81   : > { %2458 = vmatprep.subr.bf16.mxu0 %v3845_v63  ;;  %2581 = vmatprep.subr.bf16.mxu1 %v3848_v1 }
  0x84   : > { %2459 = vmatpush1.bf16.msra.mxu0 %v3843_v2  ;;  %2582 = vmatpush1.bf16.msra.mxu1 %v3846_v3 }
  0x85   : > { %2460 = vmatprep.subr.bf16.mxu0 %v3851_v4  ;;  %2583 = vmatprep.subr.bf16.mxu1 %v3854_v5 }
  0x88   : > { %2461 = vmatpush1.bf16.msra.mxu0 %v3849_v6  ;;  %2584 = vmatpush1.bf16.msra.mxu1 %v3852_v7 }
  0x89   : > { %2462 = vmatprep.subr.bf16.mxu0 %v3857_v8  ;;  %2585 = vmatprep.subr.bf16.mxu1 %v3860_v9 }
  0x8c   : > { %2463 = vmatpush1.bf16.msra.mxu0 %v3855_v10  ;;  %2586 = vmatpush1.bf16.msra.mxu1 %v3858_v11 }
  0x8d   : > { %2464 = vmatprep.subr.bf16.mxu0 %v3863_v12  ;;  %2587 = vmatprep.subr.bf16.mxu1 %v3866_v13 }
  0x90   : > { %2465 = vmatpush1.bf16.msra.mxu0 %v3861_v14  ;;  %2588 = vmatpush1.bf16.msra.mxu1 %v3864_v15 }
  0x91   : > { %2466 = vmatprep.subr.bf16.mxu0 %v3869_v16  ;;  %2589 = vmatprep.subr.bf16.mxu1 %v3872_v17 }
  0x94   : > { %2467 = vmatpush1.bf16.msra.mxu0 %v3867_v18  ;;  %2590 = vmatpush1.bf16.msra.mxu1 %v3870_v19 }
  0x95   : > { %2468 = vmatprep.subr.bf16.mxu0 %v3875_v20  ;;  %2591 = vmatprep.subr.bf16.mxu1 %v3878_v21 }
  0x98   : > { %2469 = vmatpush1.bf16.msra.mxu0 %v3873_v22  ;;  %2592 = vmatpush1.bf16.msra.mxu1 %v3876_v23 }
  0x99   : > { %2479 = vmatprep.subr.bf16.mxu0 %v3882_v24  ;;  %2602 = vmatprep.subr.bf16.mxu1 %v3885_v25 }
  0xfe   : > { %v974_v26 = vpop.f32.mrb[0].mxu0  ;;  %v1015_v27 = vpop.f32.mrb[0].mxu1 }
  0xff   : > { %v976_v28 = vpop.f32.mrb[1].mxu0  ;;  %v1017_v29 = vpop.f32.mrb[1].mxu1 }
 0x100   : > { %v1186_v30 = vmax.f32 %v974_v26, %v1017_v29  ;;  %v978_v31 = vpop.f32.mrb[2].mxu0  ;;  %v1019_v32 = vpop.f32.mrb[2].mxu1 }
 0x101   : > { %v979_v33 = vpop.f32.mrb[3].mxu0  ;;  %v1020_v34 = vpop.f32.mrb[3].mxu1 }
 0x116   : > { %v1056_v35 = vpop.f32.mrb[4].mxu0  ;;  %v1097_v36 = vpop.f32.mrb[4].mxu1 }
 0x117   : > { %v1187_v37 = vmax.f32 %v976_v28, %v1056_v35  ;;  %v1058_v38 = vpop.f32.mrb[5].mxu0  ;;  %v1099_v39 = vpop.f32.mrb[5].mxu1  ;;  %v3880_v35 = vld [vmem:[%s4303_s24 + $0x200] ss:$16 sps:$4 sm:$0xff]  }
 0x118   : > { %v1188_v40 = vmax.f32 %v1015_v27, %v1058_v38  ;;  %v1060_v41 = vpop.f32.mrb[6].mxu0  ;;  %v1101_v42 = vpop.f32.mrb[6].mxu1 }
 0x119   : > { %v1061_v43 = vpop.f32.mrb[7].mxu0  ;;  %v1102_v44 = vpop.f32.mrb[7].mxu1  ;;  %v3892_v41 = vld [vmem:[%s4303_s24 + $0x22c] ss:$16 sps:$4 sm:$0xff]   ;;  %v3887_v42 = vld [vmem:[%s4303_s24 + $0x220] ss:$16 sps:$4 sm:$0xff]  }
 0x11a   : > { %v3890_v43 = vld [vmem:[%s4303_s24 + $0x228] ss:$16 sps:$4 sm:$0xff]   ;;  %v3895_v44 = vld [vmem:[%s4303_s24 + $0x244] ss:$16 sps:$4 sm:$0xff]  }
 0x12e   : > { %v1138_v51 = vpop.f32.mrb[8].mxu0  ;;  %v1179_v52 = vpop.f32.mrb[8].mxu1 }
 0x12f   : > { %v1190_v53 = vmax.f32 %v1099_v39, %v1179_v52  ;;  %v1140_v55 = vpop.f32.mrb[9].mxu0  ;;  %v1181_v56 = vpop.f32.mrb[9].mxu1  ;;  %v3904_v52 = vld [vmem:[%s4303_s24 + $0x26c] ss:$16 sps:$4 sm:$0xff]  }
 0x130   : > { %v1189_v57 = vmax.f32 %v1097_v36, %v1140_v55  ;;  %v1191_v59 = vmax.f32 %v1138_v51, %v1181_v56  ;;  %v1142_v61 = vpop.f32.mrb[10].mxu0  ;;  %v1183_v62 = vpop.f32.mrb[10].mxu1  ;;  %v3883_v36 = vld [vmem:[%s4303_s24 + $0x208] ss:$16 sps:$4 sm:$0xff]   ;;  %v3901_v51 = vld [vmem:[%s4303_s24 + $0x264] ss:$16 sps:$4 sm:$0xff]  }
 0x131   : > { %v1193_v63 = vmax.f32 %v1187_v37, %v1190_v53  ;;  %v1143_v1 = vpop.f32.mrb[11].mxu0  ;;  %v1184_v2 = vpop.f32.mrb[11].mxu1  ;;  %v3899_v53 = vld [vmem:[%s4303_s24 + $0x260] ss:$16 sps:$4 sm:$0xff]   ;;  %v3907_v55 = vld [vmem:[%s4303_s24 + $0x284] ss:$16 sps:$4 sm:$0xff]  }
 0x132   : > { %v1192_v3 = vmax.f32 %v1186_v30, %v1189_v57  ;;  %v1194_v4 = vmax.f32 %v1188_v40, %v1191_v59  ;;  %v3889_v40 = vld [vmem:[%s4303_s24 + $0x224] ss:$16 sps:$4 sm:$0xff]   ;;  %v3910_v56 = vld [vmem:[%s4303_s24 + $0x28c] ss:$16 sps:$4 sm:$0xff]   ;;  %v3905_v57 = vld [vmem:[%s4303_s24 + $0x280] ss:$16 sps:$4 sm:$0xff]  }
 0x133   : > { %v1213_v5 = vadd.f32 %v1204_v54, %v1193_v63  ;;  %v3902_v54 = vld [vmem:[%s4303_s24 + $0x268] ss:$16 sps:$4 sm:$0xff]   ;;  %v3913_v59 = vld [vmem:[%s4303_s24 + $0x2a4] ss:$16 sps:$4 sm:$0xff]   ;;  %v3911_v61 = vld [vmem:[%s4303_s24 + $0x2a0] ss:$16 sps:$4 sm:$0xff]  }
 0x134   : > { %v1212_v6 = vadd.f32 %v1200_v58, %v1192_v3  ;;  %v1214_v7 = vadd.f32 %v1208_v60, %v1194_v4  ;;  %v3908_v58 = vld [vmem:[%s4303_s24 + $0x288] ss:$16 sps:$4 sm:$0xff]   ;;  %v3916_v60 = vld [vmem:[%s4303_s24 + $0x2ac] ss:$16 sps:$4 sm:$0xff]   ;;  %v3919_v63 = vld [vmem:[%s4303_s24 + $0x2c4] ss:$16 sps:$4 sm:$0xff]  }
 0x135   : > { %v1216_v8 = vmax.f32 %v1213_v5, 0.0  ;;  %v3914_v62 = vld [vmem:[%s4303_s24 + $0x2a8] ss:$16 sps:$4 sm:$0xff]   ;;  %v3922_v1 = vld [vmem:[%s4303_s24 + $0x2cc] ss:$16 sps:$4 sm:$0xff]  }
 0x136   : > { %v1215_v9 = vmax.f32 %v1212_v6, 0.0  ;;  %v1217_v10 = vmax.f32 %v1214_v7, 0.0  ;;  %v3917_v2 = vld [vmem:[%s4303_s24 + $0x2c0] ss:$16 sps:$4 sm:$0xff]   ;;  %v3920_v3 = vld [vmem:[%s4303_s24 + $0x2c8] ss:$16 sps:$4 sm:$0xff]  }
 0x137   : > { %1219 = vst [vmem:[#allocation2 + $0x8] sm:$0x3f] %v1216_v8  ;;  %v3925_v4 = vld [vmem:[%s4303_s24 + $0x2e4] ss:$16 sps:$4 sm:$0xff]   ;;  %v3928_v5 = vld [vmem:[%s4303_s24 + $0x2ec] ss:$16 sps:$4 sm:$0xff]  }
 0x138   : > { %1218 = vst [vmem:[#allocation2] sm:$0x3f] %v1215_v9  ;;  %1220 = vst [vmem:[#allocation2 + $0x10] sm:$0x3f] %v1217_v10  ;;  %v3923_v6 = vld [vmem:[%s4303_s24 + $0x2e0] ss:$16 sps:$4 sm:$0xff]  }
 0x139   : > { %v3926_v7 = vld [vmem:[%s4303_s24 + $0x2e8] ss:$16 sps:$4 sm:$0xff]   ;;  %v3931_v8 = vld [vmem:[%s4303_s24 + $0x304] ss:$16 sps:$4 sm:$0xff]   ;;  %v3934_v9 = vld [vmem:[%s4303_s24 + $0x30c] ss:$16 sps:$4 sm:$0xff]  }
 0x13a   : > { %v3929_v10 = vld [vmem:[%s4303_s24 + $0x300] ss:$16 sps:$4 sm:$0xff]  }
 0x13e   : > { %v1222_v11 = vld [vmem:[#allocation2 + $0x8] sm:$0x3]  ;;  %v1231_v12 = vld [vmem:[#allocation2 + $0x8] sm:$0xc]  ;;  %v1255_v14 = vld [vmem:[#allocation2 + $0x8] sm:$0x30] }
 0x13f   : > { %v1246_v13 = vld [vmem:[#allocation2 + $0x8] sm:$0xc]  ;;  %v1221_v15 = vld [vmem:[#allocation2] sm:$0x3]  ;;  %v1230_v16 = vld [vmem:[#allocation2] sm:$0xc] }
 0x140   : > { %v1245_v17 = vld [vmem:[#allocation2] sm:$0xc]  ;;  %v1254_v18 = vld [vmem:[#allocation2] sm:$0x30]  ;;  %v1223_v19 = vld [vmem:[#allocation2 + $0x10] sm:$0x3]  ;;  %v1226_v20 = vcombine.low %v1221_v15, %v1222_v11  ;;  %v1236_v21 = vcombine.low %v1230_v16, %v1231_v12 }
 0x141   : > { %v1232_v22 = vld [vmem:[#allocation2 + $0x10] sm:$0xc]  ;;  %1229 = vst [vmem:[#allocation3 + $0x8] sm:$0x3] %v1223_v19  ;;  %v1250_v24 = vcombine.low %v1245_v17, %v1246_v13  ;;  %v1260_v25 = vcombine.high %v1254_v18, %v1255_v14  ;;  %v3932_v11 = vld [vmem:[%s4303_s24 + $0x308] ss:$16 sps:$4 sm:$0xff]  }
 0x142   : > { %v1247_v23 = vld [vmem:[#allocation2 + $0x10] sm:$0xc]  ;;  %v3389_v26 = vrot.slane %v1232_v22, 10  ;;  %v3836_v27 = vld [vmem:[#allocation2 + $0x14] ss:$0 sps:$4 sm:$0x33]  }
 0x143   : > { %1253 = vst [vmem:[#allocation3 + $0x8] sm:$0xc] %v1247_v23  ;;  %1228 = vst [vmem:[#allocation3] sm:$0x33] %v1226_v20  ;;  %v3388_v28 = vrot.slane %v1236_v21, 10  ;;  %v1262_v29 = vrot.slane %v1260_v25, 6 }
 0x144   : > { %1252 = vst [vmem:[#allocation3] sm:$0xcc] %v1250_v24  ;;  %1244 = vst [vmem:[#allocation3 + $0x14] sm:$0x3] %v3389_v26  ;;  %v1263_v30 = vrot.slane %v3836_v27, 6 }
 0x145   : > { %1243 = vst [vmem:[#allocation3 + $0xc] sm:$0x33] %v3388_v28  ;;  %1266 = vst [vmem:[#allocation3 + $0xc] sm:$0xcc] %v1262_v29  ;;  %v3937_v12 = vld [vmem:[%s4303_s24 + $0x324] ss:$16 sps:$4 sm:$0xff]  }
 0x146   : > { %1267 = vst [vmem:[#allocation3 + $0x14] sm:$0xc] %v1263_v30  ;;  %v3940_v13 = vld [vmem:[%s4303_s24 + $0x32c] ss:$16 sps:$4 sm:$0xff]   ;;  %v3935_v14 = vld [vmem:[%s4303_s24 + $0x320] ss:$16 sps:$4 sm:$0xff]  }
 0x147   : > { %v3938_v15 = vld [vmem:[%s4303_s24 + $0x328] ss:$16 sps:$4 sm:$0xff]   ;;  %v3943_v16 = vld [vmem:[%s4303_s24 + $0x344] ss:$16 sps:$4 sm:$0xff]   ;;  %v3946_v17 = vld [vmem:[%s4303_s24 + $0x34c] ss:$16 sps:$4 sm:$0xff]  }
 0x148   : > { %v3941_v18 = vld [vmem:[%s4303_s24 + $0x340] ss:$16 sps:$4 sm:$0xff]   ;;  %v3944_v19 = vld [vmem:[%s4303_s24 + $0x348] ss:$16 sps:$4 sm:$0xff]   ;;  %v3949_v20 = vld [vmem:[%s4303_s24 + $0x364] ss:$16 sps:$4 sm:$0xff]  }
 0x149   : > { %v3952_v21 = vld [vmem:[%s4303_s24 + $0x36c] ss:$16 sps:$4 sm:$0xff]   ;;  %v3947_v22 = vld [vmem:[%s4303_s24 + $0x360] ss:$16 sps:$4 sm:$0xff]   ;;  %v3950_v23 = vld [vmem:[%s4303_s24 + $0x368] ss:$16 sps:$4 sm:$0xff]  }
 0x14a   : > { %v3955_v24 = vld [vmem:[%s4303_s24 + $0x384] ss:$16 sps:$4 sm:$0xff]   ;;  %v3958_v25 = vld [vmem:[%s4303_s24 + $0x38c] ss:$16 sps:$4 sm:$0xff]   ;;  %v3953_v26 = vld [vmem:[%s4303_s24 + $0x380] ss:$16 sps:$4 sm:$0xff]  }
 0x14b   : > { %v1268_v31 = vld [vmem:[#allocation3] sm:$0xff]  ;;  %v3961_v28 = vld [vmem:[%s4303_s24 + $0x3a4] ss:$16 sps:$4 sm:$0xff]   ;;  %v3959_v30 = vld [vmem:[%s4303_s24 + $0x3a0] ss:$16 sps:$4 sm:$0xff]  }
 0x14c   : > { %v1274_v32 = vcombine.high %v1268_v31, %v1268_v31  ;;  %v4424_v33 = vld [vmem:[#allocation3 + $0x8] sm:$0xff]  ;;  %v1280_v38 = vpack.c.bf16 %v1268_v31, %v1268_v31  ;;  %v3956_v27 = vld [vmem:[%s4303_s24 + $0x388] ss:$16 sps:$4 sm:$0xff]   ;;  %v3964_v29 = vld [vmem:[%s4303_s24 + $0x3ac] ss:$16 sps:$4 sm:$0xff]  }
 0x14d   : > { %v1275_v37 = vcombine.high %v4424_v33, %v4424_v33  ;;  %v3962_v31 = vld [vmem:[%s4303_s24 + $0x3a8] ss:$16 sps:$4 sm:$0xff]  }
 0x14e   : > { %v1281_v34 = vpack.c.bf16 %v1274_v32, %v1274_v32  ;;  %v3967_v32 = vld [vmem:[%s4303_s24 + $0x3c4] ss:$16 sps:$4 sm:$0xff]  }
 0x14f   : > { %v1283_v39 = vpack.c.bf16 %v1275_v37, %v1275_v37  ;;  %v3973_v37 = vld [vmem:[%s4303_s24 + $0x3e4] ss:$16 sps:$4 sm:$0xff]  }
 0x150   : > { %2470 = vmatprep.mubr.bf16.mxu0 %v1281_v34  ;;  %2593 = vmatprep.mubr.bf16.mxu1 %v1281_v34  ;;  %v3970_v34 = vld [vmem:[%s4303_s24 + $0x3cc] ss:$16 sps:$4 sm:$0xff]  }
 0x151   : > { %2471 = vmatmul.mubr.bf16.vlgmr.msra.gmra.mrb[12].mxu0 %v1280_v38  ;;  %2594 = vmatmul.mubr.bf16.vlgmr.msra.gmra.mrb[12].mxu1 %v1280_v38  ;;  %v3976_v38 = vld [vmem:[%s4303_s24 + $0x3ec] ss:$16 sps:$4 sm:$0xff]  }
 0x152   : > { %2480 = vmatpush1.bf16.msra.mxu0 %v3880_v35  ;;  %2603 = vmatpush1.bf16.msra.mxu1 %v3883_v36  ;;  %v3965_v35 = vld [vmem:[%s4303_s24 + $0x3c0] ss:$16 sps:$4 sm:$0xff]   ;;  %v3968_v36 = vld [vmem:[%s4303_s24 + $0x3c8] ss:$16 sps:$4 sm:$0xff]  }
 0x153   : > { %2511 = vmatprep.mubr.bf16.mxu0 %v1283_v39  ;;  %2634 = vmatprep.mubr.bf16.mxu1 %v1283_v39  ;;  %v4494_v39 = vld [vmem:[#allocation3 + $0x10] sm:$0xff] }
 0x154   : > { %2481 = vmatprep.subr.bf16.mxu0 %v3889_v40  ;;  %2604 = vmatprep.subr.bf16.mxu1 %v3892_v41  ;;  %v3971_v40 = vld [vmem:[%s4303_s24 + $0x3e0] ss:$16 sps:$4 sm:$0xff]   ;;  %v3974_v41 = vld [vmem:[%s4303_s24 + $0x3e8] ss:$16 sps:$4 sm:$0xff]  }
 0x156   : > { %2482 = vmatpush1.bf16.msra.mxu0 %v3887_v42  ;;  %2605 = vmatpush1.bf16.msra.mxu1 %v3890_v43  ;;  %v3979_v42 = vld [vmem:[%s4303_s24 + $0x404] ss:$16 sps:$4 sm:$0xff]   ;;  %v3982_v43 = vld [vmem:[%s4303_s24 + $0x40c] ss:$16 sps:$4 sm:$0xff]  }
 0x157   : > { %2483 = vmatprep.subr.bf16.mxu0 %v3895_v44  ;;  %2606 = vmatprep.subr.bf16.mxu1 %v3898_v45  ;;  %v1276_v44 = vcombine.high %v4494_v39, %v4494_v39  ;;  %v3977_v45 = vld [vmem:[%s4303_s24 + $0x400] ss:$16 sps:$4 sm:$0xff]  }
 0x15a   : > { %2484 = vmatpush1.bf16.msra.mxu0 %v3893_v48  ;;  %2607 = vmatpush1.bf16.msra.mxu1 %v3896_v50  ;;  %v1282_v48 = vpack.c.bf16 %v4424_v33, %v4424_v33  ;;  %v3980_v50 = vld [vmem:[%s4303_s24 + $0x408] ss:$16 sps:$4 sm:$0xff]  }
 0x15b   : > { %2485 = vmatprep.subr.bf16.mxu0 %v3901_v51  ;;  %2608 = vmatprep.subr.bf16.mxu1 %v3904_v52  ;;  %v1285_v51 = vpack.c.bf16 %v1276_v44, %v1276_v44  ;;  %v3986_v52 = vld [vmem:[%s4303_s24 + $0x424] ss:$16 sps:$4 sm:$0xff]   ;;  %v3987_v33 = vld [vmem:[%s4303_s24 + $0x428] ss:$16 sps:$4 sm:$0xff]   ;;  %v4062_v44 = vld [vmem:[%s4303_s24 + $0x5c0] ss:$16 sps:$4 sm:$0xff]  }
 0x15e   : > { %2486 = vmatpush1.bf16.msra.mxu0 %v3899_v53  ;;  %2609 = vmatpush1.bf16.msra.mxu1 %v3902_v54  ;;  %v3989_v53 = vld [vmem:[%s4303_s24 + $0x42c] ss:$16 sps:$4 sm:$0xff]   ;;  %v3984_v54 = vld [vmem:[%s4303_s24 + $0x420] ss:$16 sps:$4 sm:$0xff]  }
 0x15f   : > { %2487 = vmatprep.subr.bf16.mxu0 %v3907_v55  ;;  %2610 = vmatprep.subr.bf16.mxu1 %v3910_v56  ;;  %v3992_v55 = vld [vmem:[%s4303_s24 + $0x444] ss:$16 sps:$4 sm:$0xff]   ;;  %v3995_v56 = vld [vmem:[%s4303_s24 + $0x44c] ss:$16 sps:$4 sm:$0xff]  }
 0x162   : > { %2488 = vmatpush1.bf16.msra.mxu0 %v3905_v57  ;;  %2611 = vmatpush1.bf16.msra.mxu1 %v3908_v58  ;;  %v3990_v57 = vld [vmem:[%s4303_s24 + $0x440] ss:$16 sps:$4 sm:$0xff]   ;;  %v3993_v58 = vld [vmem:[%s4303_s24 + $0x448] ss:$16 sps:$4 sm:$0xff]  }
 0x163   : > { %2489 = vmatprep.subr.bf16.mxu0 %v3913_v59  ;;  %2612 = vmatprep.subr.bf16.mxu1 %v3916_v60  ;;  %v3998_v59 = vld [vmem:[%s4303_s24 + $0x464] ss:$16 sps:$4 sm:$0xff]   ;;  %v4001_v60 = vld [vmem:[%s4303_s24 + $0x46c] ss:$16 sps:$4 sm:$0xff]  }
 0x166   : > { %2490 = vmatpush1.bf16.msra.mxu0 %v3911_v61  ;;  %2613 = vmatpush1.bf16.msra.mxu1 %v3914_v62  ;;  %v3996_v61 = vld [vmem:[%s4303_s24 + $0x460] ss:$16 sps:$4 sm:$0xff]   ;;  %v3999_v62 = vld [vmem:[%s4303_s24 + $0x468] ss:$16 sps:$4 sm:$0xff]  }
 0x167   : > { %2491 = vmatprep.subr.bf16.mxu0 %v3919_v63  ;;  %2614 = vmatprep.subr.bf16.mxu1 %v3922_v1  ;;  %v4004_v63 = vld [vmem:[%s4303_s24 + $0x484] ss:$16 sps:$4 sm:$0xff]   ;;  %v4007_v1 = vld [vmem:[%s4303_s24 + $0x48c] ss:$16 sps:$4 sm:$0xff]  }
 0x16a   : > { %2492 = vmatpush1.bf16.msra.mxu0 %v3917_v2  ;;  %2615 = vmatpush1.bf16.msra.mxu1 %v3920_v3  ;;  %v4002_v2 = vld [vmem:[%s4303_s24 + $0x480] ss:$16 sps:$4 sm:$0xff]   ;;  %v4005_v3 = vld [vmem:[%s4303_s24 + $0x488] ss:$16 sps:$4 sm:$0xff]  }
 0x16b   : > { %2493 = vmatprep.subr.bf16.mxu0 %v3925_v4  ;;  %2616 = vmatprep.subr.bf16.mxu1 %v3928_v5  ;;  %v4010_v4 = vld [vmem:[%s4303_s24 + $0x4a4] ss:$16 sps:$4 sm:$0xff]   ;;  %v4013_v5 = vld [vmem:[%s4303_s24 + $0x4ac] ss:$16 sps:$4 sm:$0xff]  }
 0x16e   : > { %2494 = vmatpush1.bf16.msra.mxu0 %v3923_v6  ;;  %2617 = vmatpush1.bf16.msra.mxu1 %v3926_v7  ;;  %v4008_v6 = vld [vmem:[%s4303_s24 + $0x4a0] ss:$16 sps:$4 sm:$0xff]   ;;  %v4011_v7 = vld [vmem:[%s4303_s24 + $0x4a8] ss:$16 sps:$4 sm:$0xff]  }
 0x16f   : > { %2495 = vmatprep.subr.bf16.mxu0 %v3931_v8  ;;  %2618 = vmatprep.subr.bf16.mxu1 %v3934_v9  ;;  %v4016_v8 = vld [vmem:[%s4303_s24 + $0x4c4] ss:$16 sps:$4 sm:$0xff]   ;;  %v4019_v9 = vld [vmem:[%s4303_s24 + $0x4cc] ss:$16 sps:$4 sm:$0xff]  }
 0x172   : > { %2496 = vmatpush1.bf16.msra.mxu0 %v3929_v10  ;;  %2619 = vmatpush1.bf16.msra.mxu1 %v3932_v11  ;;  %v4014_v10 = vld [vmem:[%s4303_s24 + $0x4c0] ss:$16 sps:$4 sm:$0xff]   ;;  %v4017_v11 = vld [vmem:[%s4303_s24 + $0x4c8] ss:$16 sps:$4 sm:$0xff]  }
 0x173   : > { %2497 = vmatprep.subr.bf16.mxu0 %v3937_v12  ;;  %2620 = vmatprep.subr.bf16.mxu1 %v3940_v13  ;;  %v4022_v12 = vld [vmem:[%s4303_s24 + $0x4e4] ss:$16 sps:$4 sm:$0xff]   ;;  %v4025_v13 = vld [vmem:[%s4303_s24 + $0x4ec] ss:$16 sps:$4 sm:$0xff]  }
 0x176   : > { %2498 = vmatpush1.bf16.msra.mxu0 %v3935_v14  ;;  %2621 = vmatpush1.bf16.msra.mxu1 %v3938_v15  ;;  %v4020_v14 = vld [vmem:[%s4303_s24 + $0x4e0] ss:$16 sps:$4 sm:$0xff]   ;;  %v4023_v15 = vld [vmem:[%s4303_s24 + $0x4e8] ss:$16 sps:$4 sm:$0xff]  }
 0x177   : > { %2499 = vmatprep.subr.bf16.mxu0 %v3943_v16  ;;  %2622 = vmatprep.subr.bf16.mxu1 %v3946_v17  ;;  %v4028_v16 = vld [vmem:[%s4303_s24 + $0x504] ss:$16 sps:$4 sm:$0xff]   ;;  %v4031_v17 = vld [vmem:[%s4303_s24 + $0x50c] ss:$16 sps:$4 sm:$0xff]  }
 0x17a   : > { %2500 = vmatpush1.bf16.msra.mxu0 %v3941_v18  ;;  %2623 = vmatpush1.bf16.msra.mxu1 %v3944_v19  ;;  %v4026_v18 = vld [vmem:[%s4303_s24 + $0x500] ss:$16 sps:$4 sm:$0xff]   ;;  %v4029_v19 = vld [vmem:[%s4303_s24 + $0x508] ss:$16 sps:$4 sm:$0xff]  }
 0x17b   : > { %2501 = vmatprep.subr.bf16.mxu0 %v3949_v20  ;;  %2624 = vmatprep.subr.bf16.mxu1 %v3952_v21  ;;  %v4034_v20 = vld [vmem:[%s4303_s24 + $0x524] ss:$16 sps:$4 sm:$0xff]   ;;  %v4037_v21 = vld [vmem:[%s4303_s24 + $0x52c] ss:$16 sps:$4 sm:$0xff]  }
 0x17e   : > { %2502 = vmatpush1.bf16.msra.mxu0 %v3947_v22  ;;  %2625 = vmatpush1.bf16.msra.mxu1 %v3950_v23  ;;  %v4032_v22 = vld [vmem:[%s4303_s24 + $0x520] ss:$16 sps:$4 sm:$0xff]   ;;  %v4035_v23 = vld [vmem:[%s4303_s24 + $0x528] ss:$16 sps:$4 sm:$0xff]  }
 0x17f   : > { %2503 = vmatprep.subr.bf16.mxu0 %v3955_v24  ;;  %2626 = vmatprep.subr.bf16.mxu1 %v3958_v25  ;;  %v4040_v24 = vld [vmem:[%s4303_s24 + $0x544] ss:$16 sps:$4 sm:$0xff]   ;;  %v4043_v25 = vld [vmem:[%s4303_s24 + $0x54c] ss:$16 sps:$4 sm:$0xff]  }
 0x182   : > { %2504 = vmatpush1.bf16.msra.mxu0 %v3953_v26  ;;  %2627 = vmatpush1.bf16.msra.mxu1 %v3956_v27  ;;  %v4038_v26 = vld [vmem:[%s4303_s24 + $0x540] ss:$16 sps:$4 sm:$0xff]   ;;  %v4041_v27 = vld [vmem:[%s4303_s24 + $0x548] ss:$16 sps:$4 sm:$0xff]  }
 0x183   : > { %2505 = vmatprep.subr.bf16.mxu0 %v3961_v28  ;;  %2628 = vmatprep.subr.bf16.mxu1 %v3964_v29  ;;  %v4046_v28 = vld [vmem:[%s4303_s24 + $0x564] ss:$16 sps:$4 sm:$0xff]   ;;  %v4049_v29 = vld [vmem:[%s4303_s24 + $0x56c] ss:$16 sps:$4 sm:$0xff]  }
 0x186   : > { %2506 = vmatpush1.bf16.msra.mxu0 %v3959_v30  ;;  %2629 = vmatpush1.bf16.msra.mxu1 %v3962_v31  ;;  %v4044_v30 = vld [vmem:[%s4303_s24 + $0x560] ss:$16 sps:$4 sm:$0xff]   ;;  %v4047_v31 = vld [vmem:[%s4303_s24 + $0x568] ss:$16 sps:$4 sm:$0xff]  }
 0x187   : > { %2507 = vmatprep.subr.bf16.mxu0 %v3967_v32  ;;  %2630 = vmatprep.subr.bf16.mxu1 %v3970_v34  ;;  %v4052_v32 = vld [vmem:[%s4303_s24 + $0x584] ss:$16 sps:$4 sm:$0xff]   ;;  %v4055_v34 = vld [vmem:[%s4303_s24 + $0x58c] ss:$16 sps:$4 sm:$0xff]  }
 0x18a   : > { %2508 = vmatpush1.bf16.msra.mxu0 %v3965_v35  ;;  %2631 = vmatpush1.bf16.msra.mxu1 %v3968_v36  ;;  %v4050_v35 = vld [vmem:[%s4303_s24 + $0x580] ss:$16 sps:$4 sm:$0xff]   ;;  %v4053_v36 = vld [vmem:[%s4303_s24 + $0x588] ss:$16 sps:$4 sm:$0xff]  }
 0x18b   : > { %2509 = vmatprep.subr.bf16.mxu0 %v3973_v37  ;;  %2632 = vmatprep.subr.bf16.mxu1 %v3976_v38  ;;  %v4058_v37 = vld [vmem:[%s4303_s24 + $0x5a4] ss:$16 sps:$4 sm:$0xff]   ;;  %v4061_v38 = vld [vmem:[%s4303_s24 + $0x5ac] ss:$16 sps:$4 sm:$0xff]  }
 0x18e   : > { %2510 = vmatpush1.bf16.msra.mxu0 %v3971_v40  ;;  %2633 = vmatpush1.bf16.msra.mxu1 %v3974_v41  ;;  %v4056_v40 = vld [vmem:[%s4303_s24 + $0x5a0] ss:$16 sps:$4 sm:$0xff]   ;;  %v4059_v41 = vld [vmem:[%s4303_s24 + $0x5a8] ss:$16 sps:$4 sm:$0xff]  }
 0x18f   : > { %2520 = vmatprep.subr.bf16.mxu0 %v3979_v42  ;;  %2643 = vmatprep.subr.bf16.mxu1 %v3982_v43  ;;  %v4064_v42 = vld [vmem:[%s4303_s24 + $0x5c4] ss:$16 sps:$4 sm:$0xff]   ;;  %v4067_v43 = vld [vmem:[%s4303_s24 + $0x5cc] ss:$16 sps:$4 sm:$0xff]  }
 0x191   : > { %2512 = vmatmul.mubr.bf16.vlgmr.msra.gmra.mrb[12].mxu0 %v1282_v48  ;;  %2635 = vmatmul.mubr.bf16.vlgmr.msra.gmra.mrb[12].mxu1 %v1282_v48  ;;  %v4070_v48 = vld [vmem:[%s4303_s24 + $0x5e4] ss:$16 sps:$4 sm:$0xff]  }
 0x192   : > { %2521 = vmatpush1.bf16.msra.mxu0 %v3977_v45  ;;  %2552 = vmatprep.mubr.bf16.mxu0 %v1285_v51  ;;  %v4065_v45 = vld [vmem:[%s4303_s24 + $0x5c8] ss:$16 sps:$4 sm:$0xff]  }
 0x193   : > { %2644 = vmatpush1.bf16.msra.mxu1 %v3980_v50  ;;  %2675 = vmatprep.mubr.bf16.mxu1 %v1285_v51  ;;  %v4073_v50 = vld [vmem:[%s4303_s24 + $0x5ec] ss:$16 sps:$4 sm:$0xff]   ;;  %v4068_v51 = vld [vmem:[%s4303_s24 + $0x5e0] ss:$16 sps:$4 sm:$0xff]  }
 0x194   : > { %2522 = vmatprep.subr.bf16.mxu0 %v3986_v52  ;;  %2645 = vmatprep.subr.bf16.mxu1 %v3989_v53  ;;  %v4071_v52 = vld [vmem:[%s4303_s24 + $0x5e8] ss:$16 sps:$4 sm:$0xff]   ;;  %v4076_v53 = vld [vmem:[%s4440_s15 + $0x4] ss:$8 sps:$4 sm:$0xff]  }
 0x196   : > { %2523 = vmatpush1.bf16.msra.mxu0 %v3984_v54  ;;  %v4074_v54 = vld [vmem:[%s4440_s15] ss:$8 sps:$4 sm:$0xff]  }
 0x197   : > { %2646 = vmatpush1.bf16.msra.mxu1 %v3987_v33  ;;  %2524 = vmatprep.subr.bf16.mxu0 %v3992_v55  ;;  %v1284_v33 = vpack.c.bf16 %v4494_v39, %v4494_v39  ;;  %v4079_v55 = vld [vmem:[%s4440_s15 + $0x14] ss:$8 sps:$4 sm:$0xff]  }
 0x198   : > { %2647 = vmatprep.subr.bf16.mxu1 %v3995_v56  ;;  %v4077_v56 = vld [vmem:[%s4440_s15 + $0x10] ss:$8 sps:$4 sm:$0xff]   ;;  %v4085_v39 = vld [vmem:[%s4440_s15 + $0x34] ss:$8 sps:$4 sm:$0xff]  }
 0x19a   : > { %2525 = vmatpush1.bf16.msra.mxu0 %v3990_v57  ;;  %v4082_v57 = vld [vmem:[%s4440_s15 + $0x24] ss:$8 sps:$4 sm:$0xff]  }
 0x19b   : > { %2648 = vmatpush1.bf16.msra.mxu1 %v3993_v58  ;;  %2526 = vmatprep.subr.bf16.mxu0 %v3998_v59  ;;  %v4080_v58 = vld [vmem:[%s4440_s15 + $0x20] ss:$8 sps:$4 sm:$0xff]   ;;  %v4083_v59 = vld [vmem:[%s4440_s15 + $0x30] ss:$8 sps:$4 sm:$0xff]  }
 0x19c   : > { %2649 = vmatprep.subr.bf16.mxu1 %v4001_v60  ;;  %v4088_v60 = vld [vmem:[%s4440_s15 + $0x44] ss:$8 sps:$4 sm:$0xff]  }
 0x19e   : > { %2527 = vmatpush1.bf16.msra.mxu0 %v3996_v61  ;;  %v4086_v61 = vld [vmem:[%s4440_s15 + $0x40] ss:$8 sps:$4 sm:$0xff]  }
 0x19f   : > { %2650 = vmatpush1.bf16.msra.mxu1 %v3999_v62  ;;  %2528 = vmatprep.subr.bf16.mxu0 %v4004_v63  ;;  %v4091_v62 = vld [vmem:[%s4440_s15 + $0x54] ss:$8 sps:$4 sm:$0xff]   ;;  %v4089_v63 = vld [vmem:[%s4440_s15 + $0x50] ss:$8 sps:$4 sm:$0xff]  }
 0x1a0   : > { %2651 = vmatprep.subr.bf16.mxu1 %v4007_v1  ;;  %v4094_v1 = vld [vmem:[%s4440_s15 + $0x64] ss:$8 sps:$4 sm:$0xff]  }
 0x1a2   : > { %2529 = vmatpush1.bf16.msra.mxu0 %v4002_v2  ;;  %v4092_v2 = vld [vmem:[%s4440_s15 + $0x60] ss:$8 sps:$4 sm:$0xff]  }
 0x1a3   : > { %2652 = vmatpush1.bf16.msra.mxu1 %v4005_v3  ;;  %2530 = vmatprep.subr.bf16.mxu0 %v4010_v4  ;;  %v4097_v3 = vld [vmem:[%s4440_s15 + $0x74] ss:$8 sps:$4 sm:$0xff]   ;;  %v4095_v4 = vld [vmem:[%s4440_s15 + $0x70] ss:$8 sps:$4 sm:$0xff]  }
 0x1a4   : > { %2653 = vmatprep.subr.bf16.mxu1 %v4013_v5  ;;  %v4100_v5 = vld [vmem:[%s4440_s15 + $0x84] ss:$8 sps:$4 sm:$0xff]  }
 0x1a6   : > { %2531 = vmatpush1.bf16.msra.mxu0 %v4008_v6  ;;  %v4098_v6 = vld [vmem:[%s4440_s15 + $0x80] ss:$8 sps:$4 sm:$0xff]  }
 0x1a7   : > { %2654 = vmatpush1.bf16.msra.mxu1 %v4011_v7  ;;  %2532 = vmatprep.subr.bf16.mxu0 %v4016_v8  ;;  %v4103_v7 = vld [vmem:[%s4440_s15 + $0x94] ss:$8 sps:$4 sm:$0xff]   ;;  %v4101_v8 = vld [vmem:[%s4440_s15 + $0x90] ss:$8 sps:$4 sm:$0xff]  }
 0x1a8   : > { %2655 = vmatprep.subr.bf16.mxu1 %v4019_v9  ;;  %v4106_v9 = vld [vmem:[%s4440_s15 + $0xa4] ss:$8 sps:$4 sm:$0xff]  }
 0x1aa   : > { %2533 = vmatpush1.bf16.msra.mxu0 %v4014_v10  ;;  %v4104_v10 = vld [vmem:[%s4440_s15 + $0xa0] ss:$8 sps:$4 sm:$0xff]  }
 0x1ab   : > { %2656 = vmatpush1.bf16.msra.mxu1 %v4017_v11  ;;  %2534 = vmatprep.subr.bf16.mxu0 %v4022_v12  ;;  %v4109_v11 = vld [vmem:[%s4440_s15 + $0xb4] ss:$8 sps:$4 sm:$0xff]   ;;  %v4107_v12 = vld [vmem:[%s4440_s15 + $0xb0] ss:$8 sps:$4 sm:$0xff]  }
 0x1ac   : > { %2657 = vmatprep.subr.bf16.mxu1 %v4025_v13  ;;  %v4112_v13 = vld [vmem:[%s4440_s15 + $0xc4] ss:$8 sps:$4 sm:$0xff]  }
 0x1ae   : > { %2535 = vmatpush1.bf16.msra.mxu0 %v4020_v14  ;;  %v4110_v14 = vld [vmem:[%s4440_s15 + $0xc0] ss:$8 sps:$4 sm:$0xff]  }
 0x1af   : > { %2658 = vmatpush1.bf16.msra.mxu1 %v4023_v15  ;;  %2536 = vmatprep.subr.bf16.mxu0 %v4028_v16  ;;  %v4115_v15 = vld [vmem:[%s4440_s15 + $0xd4] ss:$8 sps:$4 sm:$0xff]   ;;  %v4113_v16 = vld [vmem:[%s4440_s15 + $0xd0] ss:$8 sps:$4 sm:$0xff]  }
 0x1b0   : > { %2659 = vmatprep.subr.bf16.mxu1 %v4031_v17  ;;  %v4118_v17 = vld [vmem:[%s4440_s15 + $0xe4] ss:$8 sps:$4 sm:$0xff]  }
 0x1b2   : > { %2537 = vmatpush1.bf16.msra.mxu0 %v4026_v18  ;;  %v4116_v18 = vld [vmem:[%s4440_s15 + $0xe0] ss:$8 sps:$4 sm:$0xff]  }
 0x1b3   : > { %2660 = vmatpush1.bf16.msra.mxu1 %v4029_v19  ;;  %2538 = vmatprep.subr.bf16.mxu0 %v4034_v20  ;;  %v4121_v19 = vld [vmem:[%s4440_s15 + $0xf4] ss:$8 sps:$4 sm:$0xff]   ;;  %v4119_v20 = vld [vmem:[%s4440_s15 + $0xf0] ss:$8 sps:$4 sm:$0xff]   ;;  %s500_s15 = scalar_lea.vmem %s4670_s9, %s3301_s23 }
 0x1b4   : > { %2661 = vmatprep.subr.bf16.mxu1 %v4037_v21  ;;  %v4122_v21 = vld [vmem:[%s4605_s19] sm:$0xff]  }
 0x1b6   : > { %2539 = vmatpush1.bf16.msra.mxu0 %v4032_v22  ;;  %v4123_v22 = vld [vmem:[%s4605_s19 + $0x8] sm:$0xff]  }
 0x1b7   : > { %2662 = vmatpush1.bf16.msra.mxu1 %v4035_v23  ;;  %2540 = vmatprep.subr.bf16.mxu0 %v4040_v24  ;;  %v4124_v23 = vld [vmem:[%s4605_s19 + $0x10] sm:$0xff]   ;;  %v4125_v24 = vld [vmem:[%s4605_s19 + $0x18] sm:$0xff]  }
 0x1b8   : > { %2663 = vmatprep.subr.bf16.mxu1 %v4043_v25  ;;  %v4126_v25 = vld [vmem:[%s4605_s19 + $0x20] sm:$0xff]  }
 0x1ba   : > { %2541 = vmatpush1.bf16.msra.mxu0 %v4038_v26  ;;  %v4127_v26 = vld [vmem:[%s4605_s19 + $0x28] sm:$0xff]  }
 0x1bb   : > { %2664 = vmatpush1.bf16.msra.mxu1 %v4041_v27  ;;  %2542 = vmatprep.subr.bf16.mxu0 %v4046_v28  ;;  %v4128_v27 = vld [vmem:[%s4605_s19 + $0x30] sm:$0xff]   ;;  %v4129_v28 = vld [vmem:[%s4605_s19 + $0x38] sm:$0xff]  }
 0x1bc   : > { %2665 = vmatprep.subr.bf16.mxu1 %v4049_v29  ;;  %v4130_v29 = vld [vmem:[%s4605_s19 + $0x40] sm:$0xff]  }
 0x1be   : > { %2543 = vmatpush1.bf16.msra.mxu0 %v4044_v30  ;;  %v4131_v30 = vld [vmem:[%s4605_s19 + $0x48] sm:$0xff]  }
 0x1bf   : > { %2666 = vmatpush1.bf16.msra.mxu1 %v4047_v31  ;;  %2544 = vmatprep.subr.bf16.mxu0 %v4052_v32  ;;  %v4132_v31 = vld [vmem:[%s4605_s19 + $0x50] sm:$0xff]   ;;  %v4160_v32 = vmov 1983009808  }
 0x1c0   : > { %2667 = vmatprep.subr.bf16.mxu1 %v4055_v34  ;;  %v2699_v34 = vunpack.c.l.s4 %v4160_v32 }
 0x1c2   : > { %2545 = vmatpush1.bf16.msra.mxu0 %v4050_v35 }
 0x1c3   : > { %2668 = vmatpush1.bf16.msra.mxu1 %v4053_v36  ;;  %2546 = vmatprep.subr.bf16.mxu0 %v4058_v37 }
 0x1c4   : > { %2669 = vmatprep.subr.bf16.mxu1 %v4061_v38 }
 0x1c6   : > { %2547 = vmatpush1.bf16.msra.mxu0 %v4056_v40 }
 0x1c7   : > { %2670 = vmatpush1.bf16.msra.mxu1 %v4059_v41  ;;  %2548 = vmatprep.subr.bf16.mxu0 %v4064_v42 }
 0x1c8   : > { %2671 = vmatprep.subr.bf16.mxu1 %v4067_v43  ;;  %v2700_v43 = vunpack.c.0.s8 %v2699_v34 }
 0x1ca   : > { %2549 = vmatpush1.bf16.msra.mxu0 %v4062_v44 }
 0x1cb   : > { %2672 = vmatpush1.bf16.msra.mxu1 %v4065_v45  ;;  %2550 = vmatprep.subr.bf16.mxu0 %v4070_v48  ;;  %v3582_v48 = vld [vmem:[%s476_s22] ss:$0 sm:$0xff] }
 0x1cc   : > { %2673 = vmatprep.subr.bf16.mxu1 %v4073_v50 }
 0x1ce   : > { %2551 = vmatpush1.bf16.msra.mxu0 %v4068_v51 }
 0x1cf   : > { %2674 = vmatpush1.bf16.msra.mxu1 %v4071_v52  ;;  %2926 = vmatprep.subr.bf16.mxu0 %v4076_v53  ;;  %v2703_v53 = vsub.s32 %v2700_v43, %v4412_v46 }
 0x1d0   : > { %3086 = vmatprep.subr.bf16.mxu1 %v4159_v0 }
 0x1d1   : > { %2553 = vmatmul.mubr.bf16.vlgmr.msra.gmra.mrb[12].mxu0 %v1284_v33 }
 0x1d2   : > { %2676 = vmatmul.mubr.bf16.vlgmr.msra.gmra.mrb[12].mxu1 %v1284_v33  ;;  %2927 = vmatpush1.bf16.msra.mxu0 %v4074_v54 }
 0x1d3   : > { %2928 = vmatprep.subr.bf16.mxu0 %v4079_v55  ;;  %3087 = vmatpush1.bf16.msra.mxu1 %v4122_v21 }
 0x1d4   : > { %3088 = vmatprep.subr.bf16.mxu1 %v4159_v0 }
 0x1d6   : > { %2929 = vmatpush1.bf16.msra.mxu0 %v4077_v56 }
 0x1d7   : > { %2930 = vmatprep.subr.bf16.mxu0 %v4082_v57  ;;  %3089 = vmatpush1.bf16.msra.mxu1 %v4123_v22 }
 0x1d8   : > { %3090 = vmatprep.subr.bf16.mxu1 %v4159_v0 }
 0x1da   : > { %2931 = vmatpush1.bf16.msra.mxu0 %v4080_v58 }
 0x1db   : > { %2932 = vmatprep.subr.bf16.mxu0 %v4085_v39  ;;  %3091 = vmatpush1.bf16.msra.mxu1 %v4124_v23 }
 0x1dc   : > { %3092 = vmatprep.subr.bf16.mxu1 %v4159_v0 }
 0x1de   : > { %2933 = vmatpush1.bf16.msra.mxu0 %v4083_v59  ;;  %v4133_v59 = vld [vmem:[%s4605_s19 + $0x58] sm:$0xff]  }
 0x1df   : > { %2934 = vmatprep.subr.bf16.mxu0 %v4088_v60  ;;  %3093 = vmatpush1.bf16.msra.mxu1 %v4125_v24  ;;  %v4134_v60 = vld [vmem:[%s4605_s19 + $0x60] ss:$0 sps:$4 sm:$0xff]  }
 0x1e0   : > { %3094 = vmatprep.subr.bf16.mxu1 %v4159_v0 }
 0x1e2   : > { %2935 = vmatpush1.bf16.msra.mxu0 %v4086_v61  ;;  %v3084_v61 = vsel %vm3082_vm2, %v4134_v60, 0 }
 0x1e3   : > { %2936 = vmatprep.subr.bf16.mxu0 %v4091_v62  ;;  %3095 = vmatpush1.bf16.msra.mxu1 %v4126_v25  ;;  %v2754_v62 = vld [vmem:[%s485_s26] sm:$0x3] }
 0x1e4   : > { %3096 = vmatprep.subr.bf16.mxu1 %v4159_v0 }
 0x1e6   : > { %2937 = vmatpush1.bf16.msra.mxu0 %v4089_v63  ;;  %v2759_v63 = vrot.slane %v2754_v62, %v1199_v49  ;;  %v3616_v49 = vld [vmem:[%s493_s29] ss:$0 sm:$0xff] }
 0x1e7   : > { %2938 = vmatprep.subr.bf16.mxu0 %v4094_v1  ;;  %3097 = vmatpush1.bf16.msra.mxu1 %v4127_v26  ;;  %v2763_v1 = vrot.slane %v2754_v62, %v1203_v47 }
 0x1e8   : > { %3098 = vmatprep.subr.bf16.mxu1 %v4159_v0 }
 0x1ea   : > { %2939 = vmatpush1.bf16.msra.mxu0 %v4092_v2 }
 0x1eb   : > { %2940 = vmatprep.subr.bf16.mxu0 %v4097_v3  ;;  %3099 = vmatpush1.bf16.msra.mxu1 %v4128_v27 }
 0x1ec   : > { %3100 = vmatprep.subr.bf16.mxu1 %v4159_v0 }
 0x1ee   : > { %2941 = vmatpush1.bf16.msra.mxu0 %v4095_v4 }
 0x1ef   : > { %2942 = vmatprep.subr.bf16.mxu0 %v4100_v5  ;;  %3101 = vmatpush1.bf16.msra.mxu1 %v4129_v28 }
 0x1f0   : > { %3102 = vmatprep.subr.bf16.mxu1 %v4159_v0 }
 0x1f2   : > { %2943 = vmatpush1.bf16.msra.mxu0 %v4098_v6 }
 0x1f3   : > { %2944 = vmatprep.subr.bf16.mxu0 %v4103_v7  ;;  %3103 = vmatpush1.bf16.msra.mxu1 %v4130_v29 }
 0x1f4   : > { %3104 = vmatprep.subr.bf16.mxu1 %v4159_v0 }
 0x1f6   : > { %2945 = vmatpush1.bf16.msra.mxu0 %v4101_v8 }
 0x1f7   : > { %2946 = vmatprep.subr.bf16.mxu0 %v4106_v9  ;;  %3105 = vmatpush1.bf16.msra.mxu1 %v4131_v30 }
 0x1f8   : > { %3106 = vmatprep.subr.bf16.mxu1 %v4159_v0 }
 0x1fa   : > { %2947 = vmatpush1.bf16.msra.mxu0 %v4104_v10 }
 0x1fb   : > { %2948 = vmatprep.subr.bf16.mxu0 %v4109_v11  ;;  %3107 = vmatpush1.bf16.msra.mxu1 %v4132_v31 }
 0x1fc   : > { %3108 = vmatprep.subr.bf16.mxu1 %v4159_v0 }
 0x1fe   : > { %2949 = vmatpush1.bf16.msra.mxu0 %v4107_v12 }
 0x1ff   : > { %2950 = vmatprep.subr.bf16.mxu0 %v4112_v13  ;;  %3109 = vmatpush1.bf16.msra.mxu1 %v4133_v59 }
 0x200   : > { %3110 = vmatprep.subr.bf16.mxu1 %v4159_v0 }
 0x202   : > { %2951 = vmatpush1.bf16.msra.mxu0 %v4110_v14 }
 0x203   : > { %2952 = vmatprep.subr.bf16.mxu0 %v4115_v15  ;;  %3111 = vmatpush1.bf16.msra.mxu1 %v3084_v61 }
 0x206   : > { %2953 = vmatpush1.bf16.msra.mxu0 %v4113_v16 }
 0x207   : > { %2954 = vmatprep.subr.bf16.mxu0 %v4118_v17 }
 0x20a   : > { %2955 = vmatpush1.bf16.msra.mxu0 %v4116_v18 }
 0x20b   : > { %2956 = vmatprep.subr.bf16.mxu0 %v4121_v19 }
 0x20e   : > { %2957 = vmatpush1.bf16.msra.mxu0 %v4119_v20 }
 0x2a4   : > { %v2554_v35 = vpop.f32.mrb[12].mxu0 }
 0x2a5   : > { %v2677_v36 = vpop.f32.mrb[12].mxu1  ;;  %v2556_v37 = vpop.f32.mrb[13].mxu0 }
 0x2a6   : > { %v2684_v38 = vmax.f32 %v2554_v35, %v2556_v37  ;;  %v2679_v40 = vpop.f32.mrb[13].mxu1  ;;  %v2558_v41 = vpop.f32.mrb[14].mxu0 }
 0x2a7   : > { %v2685_v42 = vmax.f32 %v2677_v36, %v2679_v40  ;;  %v2681_v44 = vpop.f32.mrb[14].mxu1  ;;  %v2559_v45 = vpop.f32.mrb[15].mxu0 }
 0x2a8   : > { %v2682_v50 = vpop.f32.mrb[15].mxu1 }
 0x2a9   : > { %v2686_v51 = vmax.f32 %v2684_v38, %v2685_v42 }
 0x2ab   : > { %v2694_v52 = vadd.f32 %v3582_v48, %v2686_v51 }
 0x2ad   : > { %v2695_v54 = vmax.f32 %v2694_v52, 0.0 }
 0x2af   : > { %2696 = vst [vmem:[#allocation4] sm:$0x3] %v2695_v54  ;;  %v2704_v33 = vrot.slane %v2695_v54, %v2703_v53 }
 0x2b1   : > { %v2705_v55 = vcombine.high %v2704_v33, %v2704_v33 }
 0x2b3   : > { %2707 = vst [vmem:[#allocation4 + $0x2] sm:$0x3] %v2705_v55 }
 0x2ba   : > { %v3583_v56 = vld.sshfl [vmem:[#allocation4] sm:$0x33 pattern:$0x76325410] }
 0x2bb   : > { %v2717_v57 = vcombine.high %v3583_v56, %v3583_v56  ;;  %v2720_v39 = vpack.c.bf16 %v3583_v56, %v3583_v56 }
 0x2bd   : > { %v2721_v58 = vpack.c.bf16 %v2717_v57, %v2717_v57 }
 0x2bf   : > { %2958 = vmatprep.mubr.bf16.mxu0 %v2721_v58 }
 0x2c0   : > { %2959 = vmatmul.mubr.bf16.vlgmr.msra.gmra.mrb[16].mxu0 %v2720_v39 }
 0x393   : > { %v2960_v2 = vpop.f32.mrb[16].mxu0 }
 0x394   : > { %v2961_v3 = vadd.f32 %v2960_v2, %v2759_v63  ;;  %v2962_v0 = vpop.f32.mrb[17].mxu0 }
 0x395   : > { %v2963_v4 = vadd.f32 %v2962_v0, %v2763_v1  ;;  %v2964_v5 = vpop.f32.mrb[18].mxu0 }
 0x396   : > { %v2967_v6 = vmax.f32 %v2961_v3, 0.0  ;;  %v2965_v7 = vpop.f32.mrb[19].mxu0 }
 0x397   : > { %v2968_v8 = vmax.f32 %v2963_v4, 0.0 }
 0x398   : > { %v2969_v10 = vpack.c.bf16 %v2967_v6, %v2967_v6 }
 0x399   : > { %v2970_v9 = vpack.c.bf16 %v2968_v8, %v2968_v8 }
 0x39b   : > { %3630 = vmatprep.mubr.msk.bf16.mxu1 %vm3078_vm3, %v2970_v9 }
 0x39c   : > { %3119 = vmatmul.mubr.bf16.vlgmr.msra.gmra.mrb[16].mxu1 %v2969_v10 }
 0x46f   : > { %v3120_v46 = vpop.f32.mrb[16].mxu1 }
 0x470   : > { %v3121_v47 = vadd.f32 %v3616_v49, %v3120_v46  ;;  %v3122_v11 = vpop.f32.mrb[17].mxu1 }
 0x471   : > { %v3123_v12 = vpop.f32.mrb[18].mxu1 }
 0x472   : > { %3126 = vst [vmem:[%s500_s15] sm:$0x3] %v3121_v47  ;;  %v3124_v13 = vpop.f32.mrb[19].mxu1 }
 0x473 PF: > { %s19_s11 = sadd.s32 1, %s4157_s11   ;;  %s4671_s30 = smov %s4153_s10 }
 0x474   : > { %p16_p5 = scmp.ge.s32.totalorder %s19_s11, 4   ;;  %s4672_s10 = smov %s4674_s12 }
 0x476   :  { %18 = sbr.rel (!%p16_p5) target bundleno = 2 (0x2), region = 110 }

</bundles_post_ra>
